<compile_context>
chip_gen: v6e
topology: v6e:2x2x1
jax: 0.10.0
libtpu: 0.0.40
codegen_flags: <defaults>
</compile_context>

<pallas_src>
import math
from functools import partial

import jax
import jax.numpy as jnp
import numpy as np
from jax import lax
from jax.experimental import pallas as pl
from jax.experimental.pallas import tpu as pltpu


# ---------------------------------------------------------------------------
# Kernel
# ---------------------------------------------------------------------------

def _layernorm(z, w, b, eps=1e-5):
    mu = jnp.mean(z, axis=-1, keepdims=True)
    var = jnp.mean(jnp.square(z - mu), axis=-1, keepdims=True)
    return (z - mu) * lax.rsqrt(var + eps) * w + b


def _encoder_kernel(num_heads, compute_dtype,
                    lamb_ref,                       # SMEM (L,)
                    x_ref,                          # VMEM (Bb, T, C)
                    ln1_w, ln1_b,                   # (1, C)
                    w_qkv,                          # (C, 5C)   [q1|k1|q2|k2|v]
                    wproj, bproj,                   # (C, C), (1, C)
                    lnattn_w, lnattn_b,             # (1, C)   ((1-lamb) folded in)
                    ln2_w, ln2_b,                   # (1, C)
                    wff1, bff1,                     # (C, 4C), (1, 4C)
                    wff2, bff2,                     # (4C, C), (1, C)
                    o_ref,                          # VMEM (Bb, T, C)
                    x_scr, sa_scr):                 # VMEM (Bb*T, C) f32, persistent
    l = pl.program_id(1)
    n_layers = pl.num_programs(1)
    Bb, T, C = x_ref.shape
    hs = C // num_heads
    M = Bb * T
    approx = compute_dtype != jnp.float32

    def mm(a, b):
        # MXU matmul, low-precision operands, f32 accumulation.
        return jnp.dot(a.astype(compute_dtype), b.astype(compute_dtype),
                       preferred_element_type=jnp.float32)

    def bmm_qkT(a, b):          # (Bb,T,hs) x (Bb,T,hs) -> (Bb,T,T), no transpose
        return jnp.einsum('btd,bud->btu',
                          a.astype(compute_dtype), b.astype(compute_dtype),
                          preferred_element_type=jnp.float32)

    def bmm_pv(w, v):           # (Bb,T,T) x (Bb,T,hs) -> (Bb,T,hs)
        return jnp.einsum('btu,bud->btd',
                          w.astype(compute_dtype), v.astype(compute_dtype),
                          preferred_element_type=jnp.float32)

    def softmax(s):
        m = jnp.max(s, axis=-1, keepdims=True)
        e = jnp.exp(s - m)
        den = jnp.sum(e, axis=-1, keepdims=True)
        return e * pl.reciprocal(den, approx=approx)      # EUP, not a VALU divide

    # ---- layer 0: load the activation block into the persistent scratch ----
    @pl.when(l == 0)
    def _():
        x_scr[...] = x_ref[...].reshape(M, C).astype(jnp.float32)

    lamb = lamb_ref[l]
    x = x_scr[...]                                         # (M, C) f32

    # ---- x + MultiHeadDifferentialAttention(ln1(x)) ----
    xn = _layernorm(x, ln1_w[...], ln1_b[...])
    qkv = mm(xn, w_qkv[...])                               # (M, 5C), M = Bb*T fills MXU
    qkv_b = qkv.reshape(Bb, T, 5 * C)
    q1 = qkv_b[:, :, 0 * C:1 * C]                          # 1/sqrt(hs) baked into wq*
    k1 = qkv_b[:, :, 1 * C:2 * C]
    q2 = qkv_b[:, :, 2 * C:3 * C]
    k2 = qkv_b[:, :, 3 * C:4 * C]
    v = qkv_b[:, :, 4 * C:5 * C]
    for h in range(num_heads):                             # small static head loop
        sl = slice(h * hs, (h + 1) * hs)
        s1 = bmm_qkT(q1[:, :, sl], k1[:, :, sl])           # (Bb, T, T)
        s2 = bmm_qkT(q2[:, :, sl], k2[:, :, sl])
        wei = softmax(s1) - lamb * softmax(s2)             # dropout == identity (eval)
        sa_scr[:, sl] = bmm_pv(wei, v[:, :, sl]).reshape(M, hs)
    sa = _layernorm(sa_scr[...], lnattn_w[...], lnattn_b[...])   # (1-lamb) folded in
    x = x + mm(sa, wproj[...]) + bproj[...]

    # ---- x + FeedForward(ln2(x)) ----
    xn2 = _layernorm(x, ln2_w[...], ln2_b[...])
    h1 = jnp.maximum(mm(xn2, wff1[...]) + bff1[...], 0.0)
    x = x + mm(h1, wff2[...]) + bff2[...]

    x_scr[...] = x                                         # carry to next layer

    @pl.when(l == n_layers - 1)
    def _():
        o_ref[...] = x.reshape(Bb, T, C).astype(o_ref.dtype)


# ---------------------------------------------------------------------------
# Wrapper
# ---------------------------------------------------------------------------

_STACKED_ORDER = [
    "ln1_w", "ln1_b",
    "w_qkv",
    "wproj", "bproj",
    "lnattn_w", "lnattn_b",
    "ln2_w", "ln2_b",
    "wff1", "bff1", "wff2", "bff2",
]


def period_encoder_forward(x, packed, num_heads, batch_block=None):
    B, T, C = x.shape
    assert C % num_heads == 0
    depth = int(packed["lamb"].shape[0])
    compute_dtype = packed["compute_dtype"]
    H = num_heads
    hs = C // H
    if batch_block is None:
        batch_block = B           # all batch resident -> weights DMA'd exactly once
    assert B % batch_block == 0
    n_bblk = B // batch_block
    Mb = batch_block * T

    weight_args = [packed[k] for k in _STACKED_ORDER]

    def layer_spec(w):
        trailing = tuple(int(d) for d in w.shape[1:])
        nz = len(trailing)
        # stream one layer's slice per grid step (double-buffered by Pallas)
        return pl.BlockSpec((None,) + trailing,
                            lambda g, l, _n=nz: (l,) + (0,) * _n)

    in_specs = (
        [pl.BlockSpec(memory_space=pltpu.MemorySpace.SMEM),              # lamb (L,)
         pl.BlockSpec((batch_block, T, C), lambda g, l: (g, 0, 0))]      # x block
        + [layer_spec(w) for w in weight_args]
    )
    out_spec = pl.BlockSpec((batch_block, T, C), lambda g, l: (g, 0, 0))

    # ---- VMEM budget: per-layer weights (2-buffered) + I/O + scratch + interm ----
    per_layer_weight_bytes = sum(
        (int(w.size) // depth) * w.dtype.itemsize for w in weight_args)
    io_bytes = 2 * 2 * batch_block * T * C * x.dtype.itemsize           # x + out
    scratch_bytes = 2 * Mb * C * 4                                      # x_scr, sa_scr
    interm_bytes = (Mb * 5 * C + Mb * 4 * C + 6 * Mb * C
                    + 2 * batch_block * T * T) * 4                      # f32 temps
    needed = (2 * per_layer_weight_bytes + io_bytes + scratch_bytes
              + 2 * interm_bytes + (8 << 20))
    try:
        phys = int(pltpu.get_tpu_info().vmem_capacity_bytes)
    except Exception:
        phys = 64 * 2**20                                   # conservative (v7x per-TC)
    cap = max(32 * 2**20, phys - (12 << 20))                # leave compiler headroom
    vmem_limit = int(min(cap, max(needed, 32 * 2**20)))

    # ---- advisory cost estimate for the XLA scheduler ----
    flops = int(B * depth * (28 * T * C * C + 6 * H * T * T * hs))
    transcendentals = int(B * depth * 2 * H * T * T)
    bytes_accessed = int(n_bblk * depth * per_layer_weight_bytes
                         + 2 * B * T * C * x.dtype.itemsize)

    return pl.pallas_call(
        partial(_encoder_kernel, num_heads, compute_dtype),
        grid=(n_bblk, depth),
        in_specs=in_specs,
        out_specs=out_spec,
        out_shape=jax.ShapeDtypeStruct((B, T, C), x.dtype),
        scratch_shapes=[pltpu.VMEM((Mb, C), jnp.float32),    # persistent activation
                        pltpu.VMEM((Mb, C), jnp.float32)],   # head-output staging
        compiler_params=pltpu.CompilerParams(
            dimension_semantics=("parallel", "arbitrary"),
            vmem_limit_bytes=vmem_limit),
        cost_estimate=pl.CostEstimate(flops=flops,
                                      transcendentals=transcendentals,
                                      bytes_accessed=bytes_accessed),
    )(packed["lamb"], x, *weight_args)


# ---------------------------------------------------------------------------
# Host-side, one-time parameter packing
# ---------------------------------------------------------------------------

def pack_params(all_params, num_heads, compute_dtype=jnp.bfloat16):
    """Pack raw per-layer params:
       * per-head (H, C, hs) projections -> one lane-dense (C, 5C) matrix,
       * bake 1/sqrt(hs) into the q projections,
       * fold (1 - lamb) into the post-attention LayerNorm affine (exact),
       * cast the big matmul weights to the MXU compute dtype,
       * stack across layers so they stream per-layer over the grid axis.
    """
    def stack_heads(w):                     # (H, C, hs) -> (C, H*hs)
        H, C, hs = w.shape
        return jnp.transpose(w, (1, 0, 2)).reshape(C, H * hs)

    layers = []
    for p in all_params:
        C = p["wproj"].shape[0]
        hs = C // num_heads
        scale = hs ** -0.5
        lamb = p["lamb"][0]
        w_qkv = jnp.concatenate(
            [stack_heads(p["wq1"]) * scale,
             stack_heads(p["wk1"]),
             stack_heads(p["wq2"]) * scale,
             stack_heads(p["wk2"]),
             stack_heads(p["wv"])], axis=1)                        # (C, 5C)
        layers.append({
            "lamb": lamb,
            "ln1_w": p["ln1_w"], "ln1_b": p["ln1_b"],
            "w_qkv": w_qkv.astype(compute_dtype),
            "wproj": p["wproj"].astype(compute_dtype),
            "bproj": p["bproj"],
            "lnattn_w": (1.0 - lamb) * p["lnattn_w"],
            "lnattn_b": (1.0 - lamb) * p["lnattn_b"],
            "ln2_w": p["ln2_w"], "ln2_b": p["ln2_b"],
            "wff1": p["wff1"].astype(compute_dtype), "bff1": p["bff1"],
            "wff2": p["wff2"].astype(compute_dtype), "bff2": p["bff2"],
        })

    packed = {k: jnp.stack([lyr[k] for lyr in layers]) for k in _STACKED_ORDER}
    packed["lamb"] = jnp.stack([lyr["lamb"] for lyr in layers]).astype(jnp.float32)
    packed["compute_dtype"] = compute_dtype
    return packed


# ---------------------------------------------------------------------------
# Deterministic parameter init (shapes per the PyTorch __init__)
# ---------------------------------------------------------------------------

def init_block_params(key, embedding_dim, num_heads, layer):
    C = embedding_dim
    hs = C // num_heads
    ks = jax.random.split(key, 12)

    def lin(k, shape, fan_in):
        bound = 1.0 / math.sqrt(fan_in)
        return jax.random.uniform(k, shape, jnp.float32, -bound, bound)

    lambda_init = 0.8 - 0.6 * math.exp(-0.3 * (layer - 1))
    return {
        "lamb": jnp.array([lambda_init], jnp.float32),
        "ln1_w": jnp.ones((1, C), jnp.float32),
        "ln1_b": jnp.zeros((1, C), jnp.float32),
        "wq1": lin(ks[0], (num_heads, C, hs), C),
        "wk1": lin(ks[1], (num_heads, C, hs), C),
        "wq2": lin(ks[2], (num_heads, C, hs), C),
        "wk2": lin(ks[3], (num_heads, C, hs), C),
        "wv":  lin(ks[4], (num_heads, C, hs), C),
        "wproj": lin(ks[5], (C, C), C),
        "bproj": lin(ks[6], (1, C), C),
        "lnattn_w": jnp.ones((1, C), jnp.float32),
        "lnattn_b": jnp.zeros((1, C), jnp.float32),
        "ln2_w": jnp.ones((1, C), jnp.float32),
        "ln2_b": jnp.zeros((1, C), jnp.float32),
        "wff1": lin(ks[7], (C, 4 * C), C),
        "bff1": lin(ks[8], (1, 4 * C), C),
        "wff2": lin(ks[9], (4 * C, C), 4 * C),
        "bff2": lin(ks[10], (1, C), 4 * C),
    }


# ---------------------------------------------------------------------------
# Pure-JAX reference (mirrors the PyTorch forward, eval mode)
# ---------------------------------------------------------------------------

def _ref_block(x, p, num_heads):
    C = x.shape[-1]
    hs = C // num_heads
    lamb = p["lamb"][0]

    def ln(z, w, b):
        mu = z.mean(-1, keepdims=True)
        var = ((z - mu) ** 2).mean(-1, keepdims=True)
        return (z - mu) / jnp.sqrt(var + 1e-5) * w[0] + b[0]

    xn = ln(x, p["ln1_w"], p["ln1_b"])
    outs = []
    for h in range(num_heads):
        q1 = xn @ p["wq1"][h]; k1 = xn @ p["wk1"][h]
        q2 = xn @ p["wq2"][h]; k2 = xn @ p["wk2"][h]
        v = xn @ p["wv"][h]
        w1 = jax.nn.softmax(jnp.einsum("btd,bud->btu", q1, k1) * hs ** -0.5, -1)
        w2 = jax.nn.softmax(jnp.einsum("btd,bud->btu", q2, k2) * hs ** -0.5, -1)
        outs.append(jnp.einsum("btu,bud->btd", w1 - lamb * w2, v))
    sa = jnp.concatenate(outs, -1)
    sa = (1.0 - lamb) * ln(sa, p["lnattn_w"], p["lnattn_b"])
    sa = sa @ p["wproj"] + p["bproj"][0]
    x = x + sa
    xn2 = ln(x, p["ln2_w"], p["ln2_b"])
    ff = jnp.maximum(xn2 @ p["wff1"] + p["bff1"][0], 0.0) @ p["wff2"] + p["bff2"][0]
    return x + ff


def ref_forward(x, all_params, num_heads):
    for p in all_params:
        x = _ref_block(x, p, num_heads)
    return x


# ---------------------------------------------------------------------------

if __name__ == "__main__":
    B, T, C = 2, 8, 32
    num_heads, depth = 4, 2          # dropout unused at inference

    root = jax.random.PRNGKey(0)
    kx, *kblocks = jax.random.split(root, depth + 1)
    x = jax.random.normal(kx, (B, T, C), jnp.float32)
    all_params = [init_block_params(kblocks[l - 1], C, num_heads, l)
                  for l in range(1, depth + 1)]

    ref = jax.block_until_ready(ref_forward(x, all_params, num_heads))

    # 1) exact-semantics check: f32 compute path, whole batch in one block
    packed_f32 = pack_params(all_params, num_heads, compute_dtype=jnp.float32)
    out_f32 = jax.block_until_ready(period_encoder_forward(x, packed_f32, num_heads))
    np.testing.assert_allclose(np.asarray(out_f32), np.asarray(ref),
                               rtol=2e-3, atol=2e-3)

    # 2) split-batch grid path (>=2 parallel grid units -> both v7x TensorCores)
    out_split = jax.block_until_ready(
        period_encoder_forward(x, packed_f32, num_heads, batch_block=1))
    np.testing.assert_allclose(np.asarray(out_split), np.asarray(ref),
                               rtol=2e-3, atol=2e-3)

    # 3) fast path: bf16 MXU operands, f32 accumulation (looser tolerance vs f32 ref)
    packed_bf16 = pack_params(all_params, num_heads, compute_dtype=jnp.bfloat16)
    out_bf16 = jax.block_until_ready(period_encoder_forward(x, packed_bf16, num_heads))
    np.testing.assert_allclose(np.asarray(out_bf16), np.asarray(ref),
                               rtol=1e-1, atol=1e-1)

    print("KERNEL_OK")
</pallas_src>

<mosaic_0001>
module attributes {stable_mosaic.version = 11 : i64} {
  func.func @_encoder_kernel(%arg0: i32, %arg1: i32, %arg2: memref<2xf32, #tpu.memory_space<smem>>, %arg3: memref<2x8x32xf32, #tpu.memory_space<vmem>>, %arg4: memref<1x1x32xf32, #tpu.memory_space<vmem>>, %arg5: memref<1x1x32xf32, #tpu.memory_space<vmem>>, %arg6: memref<1x32x160xf32, #tpu.memory_space<vmem>>, %arg7: memref<1x32x32xf32, #tpu.memory_space<vmem>>, %arg8: memref<1x1x32xf32, #tpu.memory_space<vmem>>, %arg9: memref<1x1x32xf32, #tpu.memory_space<vmem>>, %arg10: memref<1x1x32xf32, #tpu.memory_space<vmem>>, %arg11: memref<1x1x32xf32, #tpu.memory_space<vmem>>, %arg12: memref<1x1x32xf32, #tpu.memory_space<vmem>>, %arg13: memref<1x32x128xf32, #tpu.memory_space<vmem>>, %arg14: memref<1x1x128xf32, #tpu.memory_space<vmem>>, %arg15: memref<1x128x32xf32, #tpu.memory_space<vmem>>, %arg16: memref<1x1x32xf32, #tpu.memory_space<vmem>>, %arg17: memref<2x8x32xf32, #tpu.memory_space<vmem>>, %arg18: memref<16x32xf32, #tpu.memory_space<vmem>>, %arg19: memref<16x32xf32, #tpu.memory_space<vmem>>) attributes {dimension_semantics = [#tpu.dimension_semantics<parallel>, #tpu.dimension_semantics<arbitrary>], iteration_bounds = array<i64: 1, 2>, scalar_prefetch = 0 : i64, scratch_operands = 2 : i64, tpu.core_type = #tpu.core_type<tc>, window_params = [{transform_indices = @transform_0, window_bounds = array<i64: 2>}, {transform_indices = @transform_1, window_bounds = array<i64: 2, 8, 32>}, {transform_indices = @transform_2, window_bounds = array<i64: 1, 1, 32>}, {transform_indices = @transform_3, window_bounds = array<i64: 1, 1, 32>}, {transform_indices = @transform_4, window_bounds = array<i64: 1, 32, 160>}, {transform_indices = @transform_5, window_bounds = array<i64: 1, 32, 32>}, {transform_indices = @transform_6, window_bounds = array<i64: 1, 1, 32>}, {transform_indices = @transform_7, window_bounds = array<i64: 1, 1, 32>}, {transform_indices = @transform_8, window_bounds = array<i64: 1, 1, 32>}, {transform_indices = @transform_9, window_bounds = array<i64: 1, 1, 32>}, {transform_indices = @transform_10, window_bounds = array<i64: 1, 1, 32>}, {transform_indices = @transform_11, window_bounds = array<i64: 1, 32, 128>}, {transform_indices = @transform_12, window_bounds = array<i64: 1, 1, 128>}, {transform_indices = @transform_13, window_bounds = array<i64: 1, 128, 32>}, {transform_indices = @transform_14, window_bounds = array<i64: 1, 1, 32>}, {transform_indices = @transform_15, window_bounds = array<i64: 2, 8, 32>}]} {
    %c0_i32 = arith.constant 0 : i32
    %0 = arith.cmpi eq, %arg1, %c0_i32 : i32
    %1 = arith.extui %0 : i1 to i32
    %c0_i32_0 = arith.constant 0 : i32
    %2 = arith.cmpi ne, %1, %c0_i32_0 : i32
    scf.if %2 {
      %c0_98 = arith.constant 0 : index
      %c0_99 = arith.constant 0 : index
      %c0_100 = arith.constant 0 : index
      %255 = vector.load %arg3[%c0_98, %c0_99, %c0_100] : memref<2x8x32xf32, #tpu.memory_space<vmem>>, vector<2x8x32xf32>
      %256 = vector.shape_cast %255 : vector<2x8x32xf32> to vector<16x32xf32>
      %c0_101 = arith.constant 0 : index
      %c0_102 = arith.constant 0 : index
      %257 = vector.load %arg18[%c0_101, %c0_102] : memref<16x32xf32, #tpu.memory_space<vmem>>, vector<16x32xf32>
      tpu.vector_store %arg18[%c0_101, %c0_102], %256 {strides = array<i32>} : memref<16x32xf32, #tpu.memory_space<vmem>>, vector<16x32xf32>,
    } else {
    }
    %3 = arith.index_cast %arg1 : i32 to index
    %4 = memref.load %arg2[%3] : memref<2xf32, #tpu.memory_space<smem>>
    %c0 = arith.constant 0 : index
    %c0_1 = arith.constant 0 : index
    %5 = vector.load %arg18[%c0, %c0_1] : memref<16x32xf32, #tpu.memory_space<vmem>>, vector<16x32xf32>
    %c0_2 = arith.constant 0 : index
    %c0_3 = arith.constant 0 : index
    %c0_4 = arith.constant 0 : index
    %6 = vector.load %arg4[%c0_2, %c0_3, %c0_4] : memref<1x1x32xf32, #tpu.memory_space<vmem>>, vector<1x1x32xf32>
    %7 = vector.shape_cast %6 : vector<1x1x32xf32> to vector<1x32xf32>
    %c0_5 = arith.constant 0 : index
    %c0_6 = arith.constant 0 : index
    %c0_7 = arith.constant 0 : index
    %8 = vector.load %arg5[%c0_5, %c0_6, %c0_7] : memref<1x1x32xf32, #tpu.memory_space<vmem>>, vector<1x1x32xf32>
    %9 = vector.shape_cast %8 : vector<1x1x32xf32> to vector<1x32xf32>
    %cst = arith.constant dense<0.000000e+00> : vector<16xf32>
    %10 = vector.multi_reduction <add>, %5, %cst [1] : vector<16x32xf32> to vector<16xf32>
    %11 = vector.shape_cast %10 : vector<16xf32> to vector<16x1xf32>
    %cst_8 = arith.constant 3.200000e+01 : f32
    %12 = vector.broadcast %cst_8 : f32 to vector<16x1xf32>
    %13 = arith.divf %11, %12 : vector<16x1xf32>
    %14 = vector.broadcast %13 : vector<16x1xf32> to vector<16x32xf32>
    %15 = arith.subf %5, %14 : vector<16x32xf32>
    %16 = arith.mulf %15, %15 : vector<16x32xf32>
    %cst_9 = arith.constant dense<0.000000e+00> : vector<16xf32>
    %17 = vector.multi_reduction <add>, %16, %cst_9 [1] : vector<16x32xf32> to vector<16xf32>
    %18 = vector.shape_cast %17 : vector<16xf32> to vector<16x1xf32>
    %cst_10 = arith.constant 3.200000e+01 : f32
    %19 = vector.broadcast %cst_10 : f32 to vector<16x1xf32>
    %20 = arith.divf %18, %19 : vector<16x1xf32>
    %21 = vector.broadcast %13 : vector<16x1xf32> to vector<16x32xf32>
    %22 = arith.subf %5, %21 : vector<16x32xf32>
    %cst_11 = arith.constant 9.99999974E-6 : f32
    %23 = vector.broadcast %cst_11 : f32 to vector<16x1xf32>
    %24 = arith.addf %20, %23 : vector<16x1xf32>
    %25 = math.rsqrt %24 : vector<16x1xf32>
    %26 = vector.broadcast %25 : vector<16x1xf32> to vector<16x32xf32>
    %27 = arith.mulf %22, %26 : vector<16x32xf32>
    %28 = vector.broadcast %7 : vector<1x32xf32> to vector<16x32xf32>
    %29 = arith.mulf %27, %28 : vector<16x32xf32>
    %30 = vector.broadcast %9 : vector<1x32xf32> to vector<16x32xf32>
    %31 = arith.addf %29, %30 : vector<16x32xf32>
    %c0_12 = arith.constant 0 : index
    %c0_13 = arith.constant 0 : index
    %c0_14 = arith.constant 0 : index
    %32 = vector.load %arg6[%c0_12, %c0_13, %c0_14] : memref<1x32x160xf32, #tpu.memory_space<vmem>>, vector<1x32x160xf32>
    %33 = vector.shape_cast %32 : vector<1x32x160xf32> to vector<32x160xf32>
    %cst_15 = arith.constant dense<0.000000e+00> : vector<16x160xf32>
    %34 = tpu.matmul %31, %33, %cst_15 {dimension_numbers = #tpu.dot_dimension_numbers<[1], [0], [0], [1], [0, 0, 1, 1], [], []>} : vector<16x32xf32>, vector<32x160xf32>, vector<16x160xf32> -> vector<16x160xf32>
    %35 = vector.shape_cast %34 : vector<16x160xf32> to vector<2x8x160xf32>
    %36 = vector.extract_strided_slice %35 {offsets = [0, 0, 0], sizes = [2, 8, 32], strides = [1, 1, 1]} : vector<2x8x160xf32> to vector<2x8x32xf32>
    %37 = vector.extract_strided_slice %35 {offsets = [0, 0, 32], sizes = [2, 8, 32], strides = [1, 1, 1]} : vector<2x8x160xf32> to vector<2x8x32xf32>
    %38 = vector.extract_strided_slice %35 {offsets = [0, 0, 64], sizes = [2, 8, 32], strides = [1, 1, 1]} : vector<2x8x160xf32> to vector<2x8x32xf32>
    %39 = vector.extract_strided_slice %35 {offsets = [0, 0, 96], sizes = [2, 8, 32], strides = [1, 1, 1]} : vector<2x8x160xf32> to vector<2x8x32xf32>
    %40 = vector.extract_strided_slice %35 {offsets = [0, 0, 128], sizes = [2, 8, 32], strides = [1, 1, 1]} : vector<2x8x160xf32> to vector<2x8x32xf32>
    %41 = vector.extract_strided_slice %36 {offsets = [0, 0, 0], sizes = [2, 8, 8], strides = [1, 1, 1]} : vector<2x8x32xf32> to vector<2x8x8xf32>
    %42 = vector.extract_strided_slice %37 {offsets = [0, 0, 0], sizes = [2, 8, 8], strides = [1, 1, 1]} : vector<2x8x32xf32> to vector<2x8x8xf32>
    "tpu.trace_start"() <{level = 10 : i32, message = "btd,bud->btu"}> : () -> ()
    %cst_16 = arith.constant dense<0.000000e+00> : vector<2x8x8xf32>
    %43 = tpu.matmul %41, %42, %cst_16 {dimension_numbers = #tpu.dot_dimension_numbers<[2], [2], [1], [1], [0, 0, 0, 1, 1, 1], [0], [0]>} : vector<2x8x8xf32>, vector<2x8x8xf32>, vector<2x8x8xf32> -> vector<2x8x8xf32>
    "tpu.trace_stop"() : () -> ()
    %44 = vector.extract_strided_slice %38 {offsets = [0, 0, 0], sizes = [2, 8, 8], strides = [1, 1, 1]} : vector<2x8x32xf32> to vector<2x8x8xf32>
    %45 = vector.extract_strided_slice %39 {offsets = [0, 0, 0], sizes = [2, 8, 8], strides = [1, 1, 1]} : vector<2x8x32xf32> to vector<2x8x8xf32>
    "tpu.trace_start"() <{level = 10 : i32, message = "btd,bud->btu"}> : () -> ()
    %cst_17 = arith.constant dense<0.000000e+00> : vector<2x8x8xf32>
    %46 = tpu.matmul %44, %45, %cst_17 {dimension_numbers = #tpu.dot_dimension_numbers<[2], [2], [1], [1], [0, 0, 0, 1, 1, 1], [0], [0]>} : vector<2x8x8xf32>, vector<2x8x8xf32>, vector<2x8x8xf32> -> vector<2x8x8xf32>
    "tpu.trace_stop"() : () -> ()
    %cst_18 = arith.constant dense<0xFF800000> : vector<2x8xf32>
    %47 = vector.multi_reduction <maximumf>, %43, %cst_18 [2] : vector<2x8x8xf32> to vector<2x8xf32>
    %48 = vector.shape_cast %47 : vector<2x8xf32> to vector<2x8x1xf32>
    %49 = vector.broadcast %48 : vector<2x8x1xf32> to vector<2x8x8xf32>
    %50 = arith.subf %43, %49 : vector<2x8x8xf32>
    %51 = math.exp %50 : vector<2x8x8xf32>
    %cst_19 = arith.constant dense<0.000000e+00> : vector<2x8xf32>
    %52 = vector.multi_reduction <add>, %51, %cst_19 [2] : vector<2x8x8xf32> to vector<2x8xf32>
    %53 = vector.shape_cast %52 : vector<2x8xf32> to vector<2x8x1xf32>
    %54 = tpu.reciprocal %53 : vector<2x8x1xf32> -> vector<2x8x1xf32>
    %55 = vector.broadcast %54 : vector<2x8x1xf32> to vector<2x8x8xf32>
    %56 = arith.mulf %51, %55 : vector<2x8x8xf32>
    %cst_20 = arith.constant dense<0xFF800000> : vector<2x8xf32>
    %57 = vector.multi_reduction <maximumf>, %46, %cst_20 [2] : vector<2x8x8xf32> to vector<2x8xf32>
    %58 = vector.shape_cast %57 : vector<2x8xf32> to vector<2x8x1xf32>
    %59 = vector.broadcast %58 : vector<2x8x1xf32> to vector<2x8x8xf32>
    %60 = arith.subf %46, %59 : vector<2x8x8xf32>
    %61 = math.exp %60 : vector<2x8x8xf32>
    %cst_21 = arith.constant dense<0.000000e+00> : vector<2x8xf32>
    %62 = vector.multi_reduction <add>, %61, %cst_21 [2] : vector<2x8x8xf32> to vector<2x8xf32>
    %63 = vector.shape_cast %62 : vector<2x8xf32> to vector<2x8x1xf32>
    %64 = tpu.reciprocal %63 : vector<2x8x1xf32> -> vector<2x8x1xf32>
    %65 = vector.broadcast %64 : vector<2x8x1xf32> to vector<2x8x8xf32>
    %66 = arith.mulf %61, %65 : vector<2x8x8xf32>
    %67 = vector.broadcast %4 : f32 to vector<2x8x8xf32>
    %68 = arith.mulf %67, %66 : vector<2x8x8xf32>
    %69 = arith.subf %56, %68 : vector<2x8x8xf32>
    %70 = vector.extract_strided_slice %40 {offsets = [0, 0, 0], sizes = [2, 8, 8], strides = [1, 1, 1]} : vector<2x8x32xf32> to vector<2x8x8xf32>
    "tpu.trace_start"() <{level = 10 : i32, message = "btu,bud->btd"}> : () -> ()
    %cst_22 = arith.constant dense<0.000000e+00> : vector<2x8x8xf32>
    %71 = tpu.matmul %69, %70, %cst_22 {dimension_numbers = #tpu.dot_dimension_numbers<[2], [1], [1], [2], [0, 0, 0, 1, 1, 2], [0], [0]>} : vector<2x8x8xf32>, vector<2x8x8xf32>, vector<2x8x8xf32> -> vector<2x8x8xf32>
    "tpu.trace_stop"() : () -> ()
    %72 = vector.shape_cast %71 : vector<2x8x8xf32> to vector<16x8xf32>
    %c0_23 = arith.constant 0 : index
    %c0_24 = arith.constant 0 : index
    %73 = vector.load %arg19[%c0_23, %c0_24] : memref<16x32xf32, #tpu.memory_space<vmem>>, vector<16x8xf32>
    tpu.vector_store %arg19[%c0_23, %c0_24], %72 {strides = array<i32>} : memref<16x32xf32, #tpu.memory_space<vmem>>, vector<16x8xf32>,
    %74 = vector.extract_strided_slice %36 {offsets = [0, 0, 8], sizes = [2, 8, 8], strides = [1, 1, 1]} : vector<2x8x32xf32> to vector<2x8x8xf32>
    %75 = vector.extract_strided_slice %37 {offsets = [0, 0, 8], sizes = [2, 8, 8], strides = [1, 1, 1]} : vector<2x8x32xf32> to vector<2x8x8xf32>
    "tpu.trace_start"() <{level = 10 : i32, message = "btd,bud->btu"}> : () -> ()
    %cst_25 = arith.constant dense<0.000000e+00> : vector<2x8x8xf32>
    %76 = tpu.matmul %74, %75, %cst_25 {dimension_numbers = #tpu.dot_dimension_numbers<[2], [2], [1], [1], [0, 0, 0, 1, 1, 1], [0], [0]>} : vector<2x8x8xf32>, vector<2x8x8xf32>, vector<2x8x8xf32> -> vector<2x8x8xf32>
    "tpu.trace_stop"() : () -> ()
    %77 = vector.extract_strided_slice %38 {offsets = [0, 0, 8], sizes = [2, 8, 8], strides = [1, 1, 1]} : vector<2x8x32xf32> to vector<2x8x8xf32>
    %78 = vector.extract_strided_slice %39 {offsets = [0, 0, 8], sizes = [2, 8, 8], strides = [1, 1, 1]} : vector<2x8x32xf32> to vector<2x8x8xf32>
    "tpu.trace_start"() <{level = 10 : i32, message = "btd,bud->btu"}> : () -> ()
    %cst_26 = arith.constant dense<0.000000e+00> : vector<2x8x8xf32>
    %79 = tpu.matmul %77, %78, %cst_26 {dimension_numbers = #tpu.dot_dimension_numbers<[2], [2], [1], [1], [0, 0, 0, 1, 1, 1], [0], [0]>} : vector<2x8x8xf32>, vector<2x8x8xf32>, vector<2x8x8xf32> -> vector<2x8x8xf32>
    "tpu.trace_stop"() : () -> ()
    %cst_27 = arith.constant dense<0xFF800000> : vector<2x8xf32>
    %80 = vector.multi_reduction <maximumf>, %76, %cst_27 [2] : vector<2x8x8xf32> to vector<2x8xf32>
    %81 = vector.shape_cast %80 : vector<2x8xf32> to vector<2x8x1xf32>
    %82 = vector.broadcast %81 : vector<2x8x1xf32> to vector<2x8x8xf32>
    %83 = arith.subf %76, %82 : vector<2x8x8xf32>
    %84 = math.exp %83 : vector<2x8x8xf32>
    %cst_28 = arith.constant dense<0.000000e+00> : vector<2x8xf32>
    %85 = vector.multi_reduction <add>, %84, %cst_28 [2] : vector<2x8x8xf32> to vector<2x8xf32>
    %86 = vector.shape_cast %85 : vector<2x8xf32> to vector<2x8x1xf32>
    %87 = tpu.reciprocal %86 : vector<2x8x1xf32> -> vector<2x8x1xf32>
    %88 = vector.broadcast %87 : vector<2x8x1xf32> to vector<2x8x8xf32>
    %89 = arith.mulf %84, %88 : vector<2x8x8xf32>
    %cst_29 = arith.constant dense<0xFF800000> : vector<2x8xf32>
    %90 = vector.multi_reduction <maximumf>, %79, %cst_29 [2] : vector<2x8x8xf32> to vector<2x8xf32>
    %91 = vector.shape_cast %90 : vector<2x8xf32> to vector<2x8x1xf32>
    %92 = vector.broadcast %91 : vector<2x8x1xf32> to vector<2x8x8xf32>
    %93 = arith.subf %79, %92 : vector<2x8x8xf32>
    %94 = math.exp %93 : vector<2x8x8xf32>
    %cst_30 = arith.constant dense<0.000000e+00> : vector<2x8xf32>
    %95 = vector.multi_reduction <add>, %94, %cst_30 [2] : vector<2x8x8xf32> to vector<2x8xf32>
    %96 = vector.shape_cast %95 : vector<2x8xf32> to vector<2x8x1xf32>
    %97 = tpu.reciprocal %96 : vector<2x8x1xf32> -> vector<2x8x1xf32>
    %98 = vector.broadcast %97 : vector<2x8x1xf32> to vector<2x8x8xf32>
    %99 = arith.mulf %94, %98 : vector<2x8x8xf32>
    %100 = vector.broadcast %4 : f32 to vector<2x8x8xf32>
    %101 = arith.mulf %100, %99 : vector<2x8x8xf32>
    %102 = arith.subf %89, %101 : vector<2x8x8xf32>
    %103 = vector.extract_strided_slice %40 {offsets = [0, 0, 8], sizes = [2, 8, 8], strides = [1, 1, 1]} : vector<2x8x32xf32> to vector<2x8x8xf32>
    "tpu.trace_start"() <{level = 10 : i32, message = "btu,bud->btd"}> : () -> ()
    %cst_31 = arith.constant dense<0.000000e+00> : vector<2x8x8xf32>
    %104 = tpu.matmul %102, %103, %cst_31 {dimension_numbers = #tpu.dot_dimension_numbers<[2], [1], [1], [2], [0, 0, 0, 1, 1, 2], [0], [0]>} : vector<2x8x8xf32>, vector<2x8x8xf32>, vector<2x8x8xf32> -> vector<2x8x8xf32>
    "tpu.trace_stop"() : () -> ()
    %105 = vector.shape_cast %104 : vector<2x8x8xf32> to vector<16x8xf32>
    %c0_32 = arith.constant 0 : index
    %c8 = arith.constant 8 : index
    %106 = vector.load %arg19[%c0_32, %c8] : memref<16x32xf32, #tpu.memory_space<vmem>>, vector<16x8xf32>
    tpu.vector_store %arg19[%c0_32, %c8], %105 {strides = array<i32>} : memref<16x32xf32, #tpu.memory_space<vmem>>, vector<16x8xf32>,
    %107 = vector.extract_strided_slice %36 {offsets = [0, 0, 16], sizes = [2, 8, 8], strides = [1, 1, 1]} : vector<2x8x32xf32> to vector<2x8x8xf32>
    %108 = vector.extract_strided_slice %37 {offsets = [0, 0, 16], sizes = [2, 8, 8], strides = [1, 1, 1]} : vector<2x8x32xf32> to vector<2x8x8xf32>
    "tpu.trace_start"() <{level = 10 : i32, message = "btd,bud->btu"}> : () -> ()
    %cst_33 = arith.constant dense<0.000000e+00> : vector<2x8x8xf32>
    %109 = tpu.matmul %107, %108, %cst_33 {dimension_numbers = #tpu.dot_dimension_numbers<[2], [2], [1], [1], [0, 0, 0, 1, 1, 1], [0], [0]>} : vector<2x8x8xf32>, vector<2x8x8xf32>, vector<2x8x8xf32> -> vector<2x8x8xf32>
    "tpu.trace_stop"() : () -> ()
    %110 = vector.extract_strided_slice %38 {offsets = [0, 0, 16], sizes = [2, 8, 8], strides = [1, 1, 1]} : vector<2x8x32xf32> to vector<2x8x8xf32>
    %111 = vector.extract_strided_slice %39 {offsets = [0, 0, 16], sizes = [2, 8, 8], strides = [1, 1, 1]} : vector<2x8x32xf32> to vector<2x8x8xf32>
    "tpu.trace_start"() <{level = 10 : i32, message = "btd,bud->btu"}> : () -> ()
    %cst_34 = arith.constant dense<0.000000e+00> : vector<2x8x8xf32>
    %112 = tpu.matmul %110, %111, %cst_34 {dimension_numbers = #tpu.dot_dimension_numbers<[2], [2], [1], [1], [0, 0, 0, 1, 1, 1], [0], [0]>} : vector<2x8x8xf32>, vector<2x8x8xf32>, vector<2x8x8xf32> -> vector<2x8x8xf32>
    "tpu.trace_stop"() : () -> ()
    %cst_35 = arith.constant dense<0xFF800000> : vector<2x8xf32>
    %113 = vector.multi_reduction <maximumf>, %109, %cst_35 [2] : vector<2x8x8xf32> to vector<2x8xf32>
    %114 = vector.shape_cast %113 : vector<2x8xf32> to vector<2x8x1xf32>
    %115 = vector.broadcast %114 : vector<2x8x1xf32> to vector<2x8x8xf32>
    %116 = arith.subf %109, %115 : vector<2x8x8xf32>
    %117 = math.exp %116 : vector<2x8x8xf32>
    %cst_36 = arith.constant dense<0.000000e+00> : vector<2x8xf32>
    %118 = vector.multi_reduction <add>, %117, %cst_36 [2] : vector<2x8x8xf32> to vector<2x8xf32>
    %119 = vector.shape_cast %118 : vector<2x8xf32> to vector<2x8x1xf32>
    %120 = tpu.reciprocal %119 : vector<2x8x1xf32> -> vector<2x8x1xf32>
    %121 = vector.broadcast %120 : vector<2x8x1xf32> to vector<2x8x8xf32>
    %122 = arith.mulf %117, %121 : vector<2x8x8xf32>
    %cst_37 = arith.constant dense<0xFF800000> : vector<2x8xf32>
    %123 = vector.multi_reduction <maximumf>, %112, %cst_37 [2] : vector<2x8x8xf32> to vector<2x8xf32>
    %124 = vector.shape_cast %123 : vector<2x8xf32> to vector<2x8x1xf32>
    %125 = vector.broadcast %124 : vector<2x8x1xf32> to vector<2x8x8xf32>
    %126 = arith.subf %112, %125 : vector<2x8x8xf32>
    %127 = math.exp %126 : vector<2x8x8xf32>
    %cst_38 = arith.constant dense<0.000000e+00> : vector<2x8xf32>
    %128 = vector.multi_reduction <add>, %127, %cst_38 [2] : vector<2x8x8xf32> to vector<2x8xf32>
    %129 = vector.shape_cast %128 : vector<2x8xf32> to vector<2x8x1xf32>
    %130 = tpu.reciprocal %129 : vector<2x8x1xf32> -> vector<2x8x1xf32>
    %131 = vector.broadcast %130 : vector<2x8x1xf32> to vector<2x8x8xf32>
    %132 = arith.mulf %127, %131 : vector<2x8x8xf32>
    %133 = vector.broadcast %4 : f32 to vector<2x8x8xf32>
    %134 = arith.mulf %133, %132 : vector<2x8x8xf32>
    %135 = arith.subf %122, %134 : vector<2x8x8xf32>
    %136 = vector.extract_strided_slice %40 {offsets = [0, 0, 16], sizes = [2, 8, 8], strides = [1, 1, 1]} : vector<2x8x32xf32> to vector<2x8x8xf32>
    "tpu.trace_start"() <{level = 10 : i32, message = "btu,bud->btd"}> : () -> ()
    %cst_39 = arith.constant dense<0.000000e+00> : vector<2x8x8xf32>
    %137 = tpu.matmul %135, %136, %cst_39 {dimension_numbers = #tpu.dot_dimension_numbers<[2], [1], [1], [2], [0, 0, 0, 1, 1, 2], [0], [0]>} : vector<2x8x8xf32>, vector<2x8x8xf32>, vector<2x8x8xf32> -> vector<2x8x8xf32>
    "tpu.trace_stop"() : () -> ()
    %138 = vector.shape_cast %137 : vector<2x8x8xf32> to vector<16x8xf32>
    %c0_40 = arith.constant 0 : index
    %c16 = arith.constant 16 : index
    %139 = vector.load %arg19[%c0_40, %c16] : memref<16x32xf32, #tpu.memory_space<vmem>>, vector<16x8xf32>
    tpu.vector_store %arg19[%c0_40, %c16], %138 {strides = array<i32>} : memref<16x32xf32, #tpu.memory_space<vmem>>, vector<16x8xf32>,
    %140 = vector.extract_strided_slice %36 {offsets = [0, 0, 24], sizes = [2, 8, 8], strides = [1, 1, 1]} : vector<2x8x32xf32> to vector<2x8x8xf32>
    %141 = vector.extract_strided_slice %37 {offsets = [0, 0, 24], sizes = [2, 8, 8], strides = [1, 1, 1]} : vector<2x8x32xf32> to vector<2x8x8xf32>
    "tpu.trace_start"() <{level = 10 : i32, message = "btd,bud->btu"}> : () -> ()
    %cst_41 = arith.constant dense<0.000000e+00> : vector<2x8x8xf32>
    %142 = tpu.matmul %140, %141, %cst_41 {dimension_numbers = #tpu.dot_dimension_numbers<[2], [2], [1], [1], [0, 0, 0, 1, 1, 1], [0], [0]>} : vector<2x8x8xf32>, vector<2x8x8xf32>, vector<2x8x8xf32> -> vector<2x8x8xf32>
    "tpu.trace_stop"() : () -> ()
    %143 = vector.extract_strided_slice %38 {offsets = [0, 0, 24], sizes = [2, 8, 8], strides = [1, 1, 1]} : vector<2x8x32xf32> to vector<2x8x8xf32>
    %144 = vector.extract_strided_slice %39 {offsets = [0, 0, 24], sizes = [2, 8, 8], strides = [1, 1, 1]} : vector<2x8x32xf32> to vector<2x8x8xf32>
    "tpu.trace_start"() <{level = 10 : i32, message = "btd,bud->btu"}> : () -> ()
    %cst_42 = arith.constant dense<0.000000e+00> : vector<2x8x8xf32>
    %145 = tpu.matmul %143, %144, %cst_42 {dimension_numbers = #tpu.dot_dimension_numbers<[2], [2], [1], [1], [0, 0, 0, 1, 1, 1], [0], [0]>} : vector<2x8x8xf32>, vector<2x8x8xf32>, vector<2x8x8xf32> -> vector<2x8x8xf32>
    "tpu.trace_stop"() : () -> ()
    %cst_43 = arith.constant dense<0xFF800000> : vector<2x8xf32>
    %146 = vector.multi_reduction <maximumf>, %142, %cst_43 [2] : vector<2x8x8xf32> to vector<2x8xf32>
    %147 = vector.shape_cast %146 : vector<2x8xf32> to vector<2x8x1xf32>
    %148 = vector.broadcast %147 : vector<2x8x1xf32> to vector<2x8x8xf32>
    %149 = arith.subf %142, %148 : vector<2x8x8xf32>
    %150 = math.exp %149 : vector<2x8x8xf32>
    %cst_44 = arith.constant dense<0.000000e+00> : vector<2x8xf32>
    %151 = vector.multi_reduction <add>, %150, %cst_44 [2] : vector<2x8x8xf32> to vector<2x8xf32>
    %152 = vector.shape_cast %151 : vector<2x8xf32> to vector<2x8x1xf32>
    %153 = tpu.reciprocal %152 : vector<2x8x1xf32> -> vector<2x8x1xf32>
    %154 = vector.broadcast %153 : vector<2x8x1xf32> to vector<2x8x8xf32>
    %155 = arith.mulf %150, %154 : vector<2x8x8xf32>
    %cst_45 = arith.constant dense<0xFF800000> : vector<2x8xf32>
    %156 = vector.multi_reduction <maximumf>, %145, %cst_45 [2] : vector<2x8x8xf32> to vector<2x8xf32>
    %157 = vector.shape_cast %156 : vector<2x8xf32> to vector<2x8x1xf32>
    %158 = vector.broadcast %157 : vector<2x8x1xf32> to vector<2x8x8xf32>
    %159 = arith.subf %145, %158 : vector<2x8x8xf32>
    %160 = math.exp %159 : vector<2x8x8xf32>
    %cst_46 = arith.constant dense<0.000000e+00> : vector<2x8xf32>
    %161 = vector.multi_reduction <add>, %160, %cst_46 [2] : vector<2x8x8xf32> to vector<2x8xf32>
    %162 = vector.shape_cast %161 : vector<2x8xf32> to vector<2x8x1xf32>
    %163 = tpu.reciprocal %162 : vector<2x8x1xf32> -> vector<2x8x1xf32>
    %164 = vector.broadcast %163 : vector<2x8x1xf32> to vector<2x8x8xf32>
    %165 = arith.mulf %160, %164 : vector<2x8x8xf32>
    %166 = vector.broadcast %4 : f32 to vector<2x8x8xf32>
    %167 = arith.mulf %166, %165 : vector<2x8x8xf32>
    %168 = arith.subf %155, %167 : vector<2x8x8xf32>
    %169 = vector.extract_strided_slice %40 {offsets = [0, 0, 24], sizes = [2, 8, 8], strides = [1, 1, 1]} : vector<2x8x32xf32> to vector<2x8x8xf32>
    "tpu.trace_start"() <{level = 10 : i32, message = "btu,bud->btd"}> : () -> ()
    %cst_47 = arith.constant dense<0.000000e+00> : vector<2x8x8xf32>
    %170 = tpu.matmul %168, %169, %cst_47 {dimension_numbers = #tpu.dot_dimension_numbers<[2], [1], [1], [2], [0, 0, 0, 1, 1, 2], [0], [0]>} : vector<2x8x8xf32>, vector<2x8x8xf32>, vector<2x8x8xf32> -> vector<2x8x8xf32>
    "tpu.trace_stop"() : () -> ()
    %171 = vector.shape_cast %170 : vector<2x8x8xf32> to vector<16x8xf32>
    %c0_48 = arith.constant 0 : index
    %c24 = arith.constant 24 : index
    %172 = vector.load %arg19[%c0_48, %c24] : memref<16x32xf32, #tpu.memory_space<vmem>>, vector<16x8xf32>
    tpu.vector_store %arg19[%c0_48, %c24], %171 {strides = array<i32>} : memref<16x32xf32, #tpu.memory_space<vmem>>, vector<16x8xf32>,
    %c0_49 = arith.constant 0 : index
    %c0_50 = arith.constant 0 : index
    %173 = vector.load %arg19[%c0_49, %c0_50] : memref<16x32xf32, #tpu.memory_space<vmem>>, vector<16x32xf32>
    %c0_51 = arith.constant 0 : index
    %c0_52 = arith.constant 0 : index
    %c0_53 = arith.constant 0 : index
    %174 = vector.load %arg9[%c0_51, %c0_52, %c0_53] : memref<1x1x32xf32, #tpu.memory_space<vmem>>, vector<1x1x32xf32>
    %175 = vector.shape_cast %174 : vector<1x1x32xf32> to vector<1x32xf32>
    %c0_54 = arith.constant 0 : index
    %c0_55 = arith.constant 0 : index
    %c0_56 = arith.constant 0 : index
    %176 = vector.load %arg10[%c0_54, %c0_55, %c0_56] : memref<1x1x32xf32, #tpu.memory_space<vmem>>, vector<1x1x32xf32>
    %177 = vector.shape_cast %176 : vector<1x1x32xf32> to vector<1x32xf32>
    %cst_57 = arith.constant dense<0.000000e+00> : vector<16xf32>
    %178 = vector.multi_reduction <add>, %173, %cst_57 [1] : vector<16x32xf32> to vector<16xf32>
    %179 = vector.shape_cast %178 : vector<16xf32> to vector<16x1xf32>
    %cst_58 = arith.constant 3.200000e+01 : f32
    %180 = vector.broadcast %cst_58 : f32 to vector<16x1xf32>
    %181 = arith.divf %179, %180 : vector<16x1xf32>
    %182 = vector.broadcast %181 : vector<16x1xf32> to vector<16x32xf32>
    %183 = arith.subf %173, %182 : vector<16x32xf32>
    %184 = arith.mulf %183, %183 : vector<16x32xf32>
    %cst_59 = arith.constant dense<0.000000e+00> : vector<16xf32>
    %185 = vector.multi_reduction <add>, %184, %cst_59 [1] : vector<16x32xf32> to vector<16xf32>
    %186 = vector.shape_cast %185 : vector<16xf32> to vector<16x1xf32>
    %cst_60 = arith.constant 3.200000e+01 : f32
    %187 = vector.broadcast %cst_60 : f32 to vector<16x1xf32>
    %188 = arith.divf %186, %187 : vector<16x1xf32>
    %189 = vector.broadcast %181 : vector<16x1xf32> to vector<16x32xf32>
    %190 = arith.subf %173, %189 : vector<16x32xf32>
    %cst_61 = arith.constant 9.99999974E-6 : f32
    %191 = vector.broadcast %cst_61 : f32 to vector<16x1xf32>
    %192 = arith.addf %188, %191 : vector<16x1xf32>
    %193 = math.rsqrt %192 : vector<16x1xf32>
    %194 = vector.broadcast %193 : vector<16x1xf32> to vector<16x32xf32>
    %195 = arith.mulf %190, %194 : vector<16x32xf32>
    %196 = vector.broadcast %175 : vector<1x32xf32> to vector<16x32xf32>
    %197 = arith.mulf %195, %196 : vector<16x32xf32>
    %198 = vector.broadcast %177 : vector<1x32xf32> to vector<16x32xf32>
    %199 = arith.addf %197, %198 : vector<16x32xf32>
    %c0_62 = arith.constant 0 : index
    %c0_63 = arith.constant 0 : index
    %c0_64 = arith.constant 0 : index
    %200 = vector.load %arg7[%c0_62, %c0_63, %c0_64] : memref<1x32x32xf32, #tpu.memory_space<vmem>>, vector<1x32x32xf32>
    %201 = vector.shape_cast %200 : vector<1x32x32xf32> to vector<32x32xf32>
    %cst_65 = arith.constant dense<0.000000e+00> : vector<16x32xf32>
    %202 = tpu.matmul %199, %201, %cst_65 {dimension_numbers = #tpu.dot_dimension_numbers<[1], [0], [0], [1], [0, 0, 1, 1], [], []>} : vector<16x32xf32>, vector<32x32xf32>, vector<16x32xf32> -> vector<16x32xf32>
    %203 = arith.addf %5, %202 : vector<16x32xf32>
    %c0_66 = arith.constant 0 : index
    %c0_67 = arith.constant 0 : index
    %c0_68 = arith.constant 0 : index
    %204 = vector.load %arg8[%c0_66, %c0_67, %c0_68] : memref<1x1x32xf32, #tpu.memory_space<vmem>>, vector<1x1x32xf32>
    %205 = vector.shape_cast %204 : vector<1x1x32xf32> to vector<1x32xf32>
    %206 = vector.broadcast %205 : vector<1x32xf32> to vector<16x32xf32>
    %207 = arith.addf %203, %206 : vector<16x32xf32>
    %c0_69 = arith.constant 0 : index
    %c0_70 = arith.constant 0 : index
    %c0_71 = arith.constant 0 : index
    %208 = vector.load %arg11[%c0_69, %c0_70, %c0_71] : memref<1x1x32xf32, #tpu.memory_space<vmem>>, vector<1x1x32xf32>
    %209 = vector.shape_cast %208 : vector<1x1x32xf32> to vector<1x32xf32>
    %c0_72 = arith.constant 0 : index
    %c0_73 = arith.constant 0 : index
    %c0_74 = arith.constant 0 : index
    %210 = vector.load %arg12[%c0_72, %c0_73, %c0_74] : memref<1x1x32xf32, #tpu.memory_space<vmem>>, vector<1x1x32xf32>
    %211 = vector.shape_cast %210 : vector<1x1x32xf32> to vector<1x32xf32>
    %cst_75 = arith.constant dense<0.000000e+00> : vector<16xf32>
    %212 = vector.multi_reduction <add>, %207, %cst_75 [1] : vector<16x32xf32> to vector<16xf32>
    %213 = vector.shape_cast %212 : vector<16xf32> to vector<16x1xf32>
    %cst_76 = arith.constant 3.200000e+01 : f32
    %214 = vector.broadcast %cst_76 : f32 to vector<16x1xf32>
    %215 = arith.divf %213, %214 : vector<16x1xf32>
    %216 = vector.broadcast %215 : vector<16x1xf32> to vector<16x32xf32>
    %217 = arith.subf %207, %216 : vector<16x32xf32>
    %218 = arith.mulf %217, %217 : vector<16x32xf32>
    %cst_77 = arith.constant dense<0.000000e+00> : vector<16xf32>
    %219 = vector.multi_reduction <add>, %218, %cst_77 [1] : vector<16x32xf32> to vector<16xf32>
    %220 = vector.shape_cast %219 : vector<16xf32> to vector<16x1xf32>
    %cst_78 = arith.constant 3.200000e+01 : f32
    %221 = vector.broadcast %cst_78 : f32 to vector<16x1xf32>
    %222 = arith.divf %220, %221 : vector<16x1xf32>
    %223 = vector.broadcast %215 : vector<16x1xf32> to vector<16x32xf32>
    %224 = arith.subf %207, %223 : vector<16x32xf32>
    %cst_79 = arith.constant 9.99999974E-6 : f32
    %225 = vector.broadcast %cst_79 : f32 to vector<16x1xf32>
    %226 = arith.addf %222, %225 : vector<16x1xf32>
    %227 = math.rsqrt %226 : vector<16x1xf32>
    %228 = vector.broadcast %227 : vector<16x1xf32> to vector<16x32xf32>
    %229 = arith.mulf %224, %228 : vector<16x32xf32>
    %230 = vector.broadcast %209 : vector<1x32xf32> to vector<16x32xf32>
    %231 = arith.mulf %229, %230 : vector<16x32xf32>
    %232 = vector.broadcast %211 : vector<1x32xf32> to vector<16x32xf32>
    %233 = arith.addf %231, %232 : vector<16x32xf32>
    %c0_80 = arith.constant 0 : index
    %c0_81 = arith.constant 0 : index
    %c0_82 = arith.constant 0 : index
    %234 = vector.load %arg13[%c0_80, %c0_81, %c0_82] : memref<1x32x128xf32, #tpu.memory_space<vmem>>, vector<1x32x128xf32>
    %235 = vector.shape_cast %234 : vector<1x32x128xf32> to vector<32x128xf32>
    %cst_83 = arith.constant dense<0.000000e+00> : vector<16x128xf32>
    %236 = tpu.matmul %233, %235, %cst_83 {dimension_numbers = #tpu.dot_dimension_numbers<[1], [0], [0], [1], [0, 0, 1, 1], [], []>} : vector<16x32xf32>, vector<32x128xf32>, vector<16x128xf32> -> vector<16x128xf32>
    %c0_84 = arith.constant 0 : index
    %c0_85 = arith.constant 0 : index
    %c0_86 = arith.constant 0 : index
    %237 = vector.load %arg14[%c0_84, %c0_85, %c0_86] : memref<1x1x128xf32, #tpu.memory_space<vmem>>, vector<1x1x128xf32>
    %238 = vector.shape_cast %237 : vector<1x1x128xf32> to vector<1x128xf32>
    %239 = vector.broadcast %238 : vector<1x128xf32> to vector<16x128xf32>
    %240 = arith.addf %236, %239 : vector<16x128xf32>
    %cst_87 = arith.constant 0.000000e+00 : f32
    %241 = vector.broadcast %cst_87 : f32 to vector<16x128xf32>
    %242 = arith.maximumf %240, %241 : vector<16x128xf32>
    %c0_88 = arith.constant 0 : index
    %c0_89 = arith.constant 0 : index
    %c0_90 = arith.constant 0 : index
    %243 = vector.load %arg15[%c0_88, %c0_89, %c0_90] : memref<1x128x32xf32, #tpu.memory_space<vmem>>, vector<1x128x32xf32>
    %244 = vector.shape_cast %243 : vector<1x128x32xf32> to vector<128x32xf32>
    %cst_91 = arith.constant dense<0.000000e+00> : vector<16x32xf32>
    %245 = tpu.matmul %242, %244, %cst_91 {dimension_numbers = #tpu.dot_dimension_numbers<[1], [0], [0], [1], [0, 0, 1, 1], [], []>} : vector<16x128xf32>, vector<128x32xf32>, vector<16x32xf32> -> vector<16x32xf32>
    %246 = arith.addf %207, %245 : vector<16x32xf32>
    %c0_92 = arith.constant 0 : index
    %c0_93 = arith.constant 0 : index
    %c0_94 = arith.constant 0 : index
    %247 = vector.load %arg16[%c0_92, %c0_93, %c0_94] : memref<1x1x32xf32, #tpu.memory_space<vmem>>, vector<1x1x32xf32>
    %248 = vector.shape_cast %247 : vector<1x1x32xf32> to vector<1x32xf32>
    %249 = vector.broadcast %248 : vector<1x32xf32> to vector<16x32xf32>
    %250 = arith.addf %246, %249 : vector<16x32xf32>
    %c0_95 = arith.constant 0 : index
    %c0_96 = arith.constant 0 : index
    %251 = vector.load %arg18[%c0_95, %c0_96] : memref<16x32xf32, #tpu.memory_space<vmem>>, vector<16x32xf32>
    tpu.vector_store %arg18[%c0_95, %c0_96], %250 {strides = array<i32>} : memref<16x32xf32, #tpu.memory_space<vmem>>, vector<16x32xf32>,
    %c1_i32 = arith.constant 1 : i32
    %252 = arith.cmpi eq, %arg1, %c1_i32 : i32
    %253 = arith.extui %252 : i1 to i32
    %c0_i32_97 = arith.constant 0 : i32
    %254 = arith.cmpi ne, %253, %c0_i32_97 : i32
    scf.if %254 {
      %255 = vector.shape_cast %250 : vector<16x32xf32> to vector<2x8x32xf32>
      %c0_98 = arith.constant 0 : index
      %c0_99 = arith.constant 0 : index
      %c0_100 = arith.constant 0 : index
      %256 = vector.load %arg17[%c0_98, %c0_99, %c0_100] : memref<2x8x32xf32, #tpu.memory_space<vmem>>, vector<2x8x32xf32>
      tpu.vector_store %arg17[%c0_98, %c0_99, %c0_100], %255 {strides = array<i32>} : memref<2x8x32xf32, #tpu.memory_space<vmem>>, vector<2x8x32xf32>,
    } else {
    }
    return
  }
  func.func @transform_0(%arg0: i32, %arg1: i32) -> i32 {
    %c0_i32 = arith.constant 0 : i32
    %c0_i32_0 = arith.constant 0 : i32
    return %c0_i32 : i32
  }
  func.func @transform_1(%arg0: i32, %arg1: i32) -> (i32, i32, i32) {
    %c0_i32 = arith.constant 0 : i32
    %c0_i32_0 = arith.constant 0 : i32
    %c0_i32_1 = arith.constant 0 : i32
    return %arg0, %c0_i32, %c0_i32_0 : i32, i32, i32
  }
  func.func @transform_2(%arg0: i32, %arg1: i32) -> (i32, i32, i32) {
    %c0_i32 = arith.constant 0 : i32
    %c0_i32_0 = arith.constant 0 : i32
    %c0_i32_1 = arith.constant 0 : i32
    return %arg1, %c0_i32, %c0_i32_0 : i32, i32, i32
  }
  func.func @transform_3(%arg0: i32, %arg1: i32) -> (i32, i32, i32) {
    %c0_i32 = arith.constant 0 : i32
    %c0_i32_0 = arith.constant 0 : i32
    %c0_i32_1 = arith.constant 0 : i32
    return %arg1, %c0_i32, %c0_i32_0 : i32, i32, i32
  }
  func.func @transform_4(%arg0: i32, %arg1: i32) -> (i32, i32, i32) {
    %c0_i32 = arith.constant 0 : i32
    %c0_i32_0 = arith.constant 0 : i32
    %c0_i32_1 = arith.constant 0 : i32
    return %arg1, %c0_i32, %c0_i32_0 : i32, i32, i32
  }
  func.func @transform_5(%arg0: i32, %arg1: i32) -> (i32, i32, i32) {
    %c0_i32 = arith.constant 0 : i32
    %c0_i32_0 = arith.constant 0 : i32
    %c0_i32_1 = arith.constant 0 : i32
    return %arg1, %c0_i32, %c0_i32_0 : i32, i32, i32
  }
  func.func @transform_6(%arg0: i32, %arg1: i32) -> (i32, i32, i32) {
    %c0_i32 = arith.constant 0 : i32
    %c0_i32_0 = arith.constant 0 : i32
    %c0_i32_1 = arith.constant 0 : i32
    return %arg1, %c0_i32, %c0_i32_0 : i32, i32, i32
  }
  func.func @transform_7(%arg0: i32, %arg1: i32) -> (i32, i32, i32) {
    %c0_i32 = arith.constant 0 : i32
    %c0_i32_0 = arith.constant 0 : i32
    %c0_i32_1 = arith.constant 0 : i32
    return %arg1, %c0_i32, %c0_i32_0 : i32, i32, i32
  }
  func.func @transform_8(%arg0: i32, %arg1: i32) -> (i32, i32, i32) {
    %c0_i32 = arith.constant 0 : i32
    %c0_i32_0 = arith.constant 0 : i32
    %c0_i32_1 = arith.constant 0 : i32
    return %arg1, %c0_i32, %c0_i32_0 : i32, i32, i32
  }
  func.func @transform_9(%arg0: i32, %arg1: i32) -> (i32, i32, i32) {
    %c0_i32 = arith.constant 0 : i32
    %c0_i32_0 = arith.constant 0 : i32
    %c0_i32_1 = arith.constant 0 : i32
    return %arg1, %c0_i32, %c0_i32_0 : i32, i32, i32
  }
  func.func @transform_10(%arg0: i32, %arg1: i32) -> (i32, i32, i32) {
    %c0_i32 = arith.constant 0 : i32
    %c0_i32_0 = arith.constant 0 : i32
    %c0_i32_1 = arith.constant 0 : i32
    return %arg1, %c0_i32, %c0_i32_0 : i32, i32, i32
  }
  func.func @transform_11(%arg0: i32, %arg1: i32) -> (i32, i32, i32) {
    %c0_i32 = arith.constant 0 : i32
    %c0_i32_0 = arith.constant 0 : i32
    %c0_i32_1 = arith.constant 0 : i32
    return %arg1, %c0_i32, %c0_i32_0 : i32, i32, i32
  }
  func.func @transform_12(%arg0: i32, %arg1: i32) -> (i32, i32, i32) {
    %c0_i32 = arith.constant 0 : i32
    %c0_i32_0 = arith.constant 0 : i32
    %c0_i32_1 = arith.constant 0 : i32
    return %arg1, %c0_i32, %c0_i32_0 : i32, i32, i32
  }
  func.func @transform_13(%arg0: i32, %arg1: i32) -> (i32, i32, i32) {
    %c0_i32 = arith.constant 0 : i32
    %c0_i32_0 = arith.constant 0 : i32
    %c0_i32_1 = arith.constant 0 : i32
    return %arg1, %c0_i32, %c0_i32_0 : i32, i32, i32
  }
  func.func @transform_14(%arg0: i32, %arg1: i32) -> (i32, i32, i32) {
    %c0_i32 = arith.constant 0 : i32
    %c0_i32_0 = arith.constant 0 : i32
    %c0_i32_1 = arith.constant 0 : i32
    return %arg1, %c0_i32, %c0_i32_0 : i32, i32, i32
  }
  func.func @transform_15(%arg0: i32, %arg1: i32) -> (i32, i32, i32) {
    %c0_i32 = arith.constant 0 : i32
    %c0_i32_0 = arith.constant 0 : i32
    %c0_i32_1 = arith.constant 0 : i32
    return %arg0, %c0_i32, %c0_i32_0 : i32, i32, i32
  }
}

</mosaic_0001>

<bundles_post_ra>
// kernel: tpu_custom_call.1
= control target key start
LH: loop header
LB: loop body
LE: loop exit
PB: predicated region body
PF: predicated region fallthrough
CT: control target
= control target key end

     0   :  { %s4687_s0 = inlined_call_operand.vmem [shape: f32[2], index: 0, kind: input, shape index: {}]   ;;  %s4688_s1 = inlined_call_operand.vmem [shape: f32[2,8,32], index: 1, kind: input, shape index: {}]   ;;  %s4689_s2 = inlined_call_operand.vmem [shape: f32[2,1,32], index: 2, kind: input, shape index: {}]   ;;  %s4690_s3 = inlined_call_operand.vmem [shape: f32[2,1,32], index: 3, kind: input, shape index: {}]   ;;  %s4691_s4 = inlined_call_operand.vmem [shape: f32[2,32,160], index: 4, kind: input, shape index: {}]   ;;  %s4692_s5 = inlined_call_operand.vmem [shape: f32[2,32,32], index: 5, kind: input, shape index: {}]   ;;  %s4693_s6 = inlined_call_operand.vmem [shape: f32[2,1,32], index: 6, kind: input, shape index: {}]   ;;  %s4694_s7 = inlined_call_operand.vmem [shape: f32[2,1,32], index: 7, kind: input, shape index: {}]   ;;  %s4695_s8 = inlined_call_operand.vmem [shape: f32[2,1,32], index: 8, kind: input, shape index: {}]   ;;  %s4696_s9 = inlined_call_operand.vmem [shape: f32[2,1,32], index: 9, kind: input, shape index: {}]   ;;  %s4697_s10 = inlined_call_operand.vmem [shape: f32[2,1,32], index: 10, kind: input, shape index: {}]   ;;  %s4698_s11 = inlined_call_operand.vmem [shape: f32[2,32,128], index: 11, kind: input, shape index: {}]   ;;  %s4699_s12 = inlined_call_operand.vmem [shape: f32[2,1,128], index: 12, kind: input, shape index: {}]   ;;  %s4700_s13 = inlined_call_operand.vmem [shape: f32[2,128,32], index: 13, kind: input, shape index: {}]   ;;  %s4701_s14 = inlined_call_operand.vmem [shape: f32[2,1,32], index: 14, kind: input, shape index: {}]   ;;  %s4702_s15 = inlined_call_operand.hbm [shape: f32[2,8,32], index: 15, kind: output, shape index: {}]  }
   0x1   :  { %4707 = sst [smem:[#allocation14_spill]] %s4687_s0 }
   0x2   :  { %4708 = sst [smem:[#allocation15_spill]] %s4689_s2 }
   0x3   :  { %4709 = sst [smem:[#allocation16_spill]] %s4690_s3 }
   0x4   :  { %4710 = sst [smem:[#allocation17_spill]] %s4691_s4 }
   0x5   :  { %4711 = sst [smem:[#allocation18_spill]] %s4692_s5 }
   0x6   :  { %4712 = sst [smem:[#allocation19_spill]] %s4702_s15 }
   0x7   :  { %20 = vsyncpa [#allocation6], 0 }
   0x8   :  { %21 = vsyncpa [#allocation5], 0  ;;  %s4189_s18 = smov 0   ;;  %s4191_s19 = smov 0  }
   0x9   :  { %s4193_s20 = smov 0  }
   0xa LB: > { %4713 = sst [smem:[#allocation10_spill]] %s4083_s19  ;;  %s4703_s21 = sadd.s32 4294967295, %s4087_s20   ;;  %s4087_s20 = sphi %s4193_s20, %s27_s20   ;;  %s4083_s19 = sphi %s4191_s19, %s4737_s19   ;;  %s4079_s18 = sphi %s4189_s18, %s4736_s18  }
   0xb   : > { %4714 = sst [smem:[#allocation11_spill]] %s4087_s20  ;;  %s36_s22 = sadd.s32 1, %s4083_s19 }
   0xc   : > { %p37_p0 = scmp.ge.s32.totalorder %s36_s22, 2  ;;  %p3546_p1 = scmp.ge.s32.totalorder %s4087_s20, 1 }
   0xd   : > { %p455_p2 = scmp.lt.s32.totalorder %s4087_s20, 3  ;;  %p4216_p4 = scmp.eq.s32.totalorder %s4703_s21, 0 }
   0xe   : > { %s4739_s22 = smov (%p37_p0, %s36_s22), 0  ;;  %s4718_s0 = sld [smem:[#allocation14_spill]] }
   0xf   : > { %4715 = sst [smem:[#allocation12_spill]] %s4739_s22  ;;  %p4210_p3 = pnand %p3546_p1, %p455_p2 }
  0x11   : > { %p3888_p5 = pneg %p4210_p3 }
  0x13   : > { %p3889_p6 = pnand %p4216_p4, %p3888_p5 }
  0x14   : > { %s468_s27 = sshll.u32 %s4718_s0, 4  ;;  %s469_s27 = int_to_ptr.vmem [resolvable:$true] %s468_s27 }
  0x15   : > { %s4018_s28 = scalar_lea.vmem %s469_s27, 16  ;;  %p4020_p8 = pneg %p3889_p6 }
  0x16   : > { %p4019_p7 = scmp.ne.s32.totalorder %s469_s27, %s4018_s28  ;;  %p4026_p11 = scmp.lt.s32.totalorder %s469_s27, %s469_s27 }
  0x17   : > { %p4027_p12 = scmp.lt.s32.totalorder %s4018_s28, %s4018_s28 }
  0x18   : > { %p4021_p9 = pnand %p4020_p8, %p4019_p7 }
  0x19   : > { %p4028_p13 = por %p4027_p12, %p4026_p11 }
  0x1a   : > { %p4022_p10 = pneg %p4021_p9 }
  0x1c   : > { %p4029_p0 = pnand %p4028_p13, %p4022_p10 }
  0x1e   : > { %4032 = shalt.err (!%p4029_p0)
}
  0x1f   : > { %s4089_s29 = smov [#allocation4]   ;;  %576 = sbr.rel (%p4210_p3) target bundleno = 4318 (0x10de), region = 80 }
  0x20   : > { %3891 = dma.vmem_to_smem (!%p3889_p6), %s469_s27, 16, %s4089_s29, [#allocation6]  }
  0x24   : > { %4070 = dma.done.wait (%p4216_p4), [#allocation6], 16  }
  0x25   : > { %4072 = vsyncadd (%p4216_p4), [#allocation6], 4294967280 }
  0x26   : > { %582 = sfence }
  0x27   : > { %p673_p1 = scmp.lt.s32.totalorder %s4079_s18, 1  ;;  %s4721_s4 = sld [smem:[#allocation17_spill]] }
  0x28   : > { %s4722_s5 = sld [smem:[#allocation18_spill]]  ;;  %p3560_p2 = scmp.ne.s32.totalorder %s4079_s18, 0 }
  0x29   : > { %s4235_s30 = scalar_select %p673_p1, %s4079_s18, 1 }
  0x2b   : > { %s3621_s27 = sshll.u32 %s4235_s30, 6  ;;  %s3622_s28 = sshll.u32 %s4235_s30, 5 }
  0x2c   : > { %s694_s24 = scalar_lea.vmem %s4694_s7, %s4235_s30  ;;  %s700_s16 = scalar_lea.vmem %s4696_s9, %s4235_s30 }
  0x2d   : > { %s4250_s17 = scalar_lea.vmem %s4721_s4, %s3621_s27  ;;  %s703_s21 = scalar_lea.vmem %s4697_s10, %s4235_s30 }
  0x2e   : > { %s4255_s22 = scalar_lea.vmem %s4722_s5, %s3622_s28  ;;  %s4280_s15 = scalar_lea.vmem %s4698_s11, %s3622_s28 }
  0x2f   : > { %4723 = sst [smem:[#allocation13_spill]] %s4255_s22  ;;  %s711_s20 = scalar_lea.vmem %s4699_s12, %s4235_s30 }
  0x30   : > { %s3624_s23 = sshll.u32 %s4235_s30, 7  ;;  %s719_s4 = scalar_lea.vmem %s4701_s14, %s4235_s30 }
  0x31   : > { %s4290_s3 = scalar_lea.vmem %s4700_s13, %s3624_s23  ;;  %724 = sbr.rel (%p3560_p2) target bundleno = 56 (0x38), region = 88 }
  0x36   : > { %v725_v0 = vld [vmem:[%s4688_s1] sm:$0xff]  ;;  %vm727_vm0 = vcmask 261120   ;;  %v726_v1 = vld [vmem:[%s4688_s1 + $0x8] sm:$0xff] }
  0x37   : > { %728 = vst.msk [vmem:[#allocation2] sm:$0xff] %vm727_vm0, %v725_v0  ;;  %729 = vst.msk [vmem:[#allocation2 + $0x8] sm:$0xff] %vm727_vm0, %v726_v1 }
  0x38 PF: > { %vm735_vm1 = vcmask 261120   ;;  %v786_v16 = vld [vmem:[%s4250_s17 + $0x38] sm:$0xff]  ;;  %v785_v17 = vld [vmem:[%s4250_s17 + $0x30] sm:$0xff]  ;;  %v784_v18 = vld [vmem:[%s4250_s17 + $0x28] sm:$0xff]  ;;  %v4090_v20 = vmov 0.0   ;;  %s4724_s2 = sld [smem:[#allocation15_spill]] }
  0x39   : > { %817 = vmatprep.subr.mxu0 %v786_v16  ;;  %v783_v19 = vld [vmem:[%s4250_s17 + $0x20] sm:$0xff]  ;;  %857 = vmatprep.mubr.f32.mxu0 %v4090_v20  ;;  %v782_v21 = vld [vmem:[%s4250_s17 + $0x18] sm:$0xff]  ;;  %v781_v22 = vld [vmem:[%s4250_s17 + $0x10] sm:$0xff]  ;;  %s4726_s29 = sld [smem:[#allocation16_spill]]  ;;  %vm4091_vm2 = vmmov 0   ;;  %s4092_s5 = smov 96  }
  0x3a   : > { %818 = vmatpush1.msra.mxu0 %v785_v17  ;;  %3708 = vmatprep.subr.mxu1 %v4090_v20  ;;  %v780_v23 = vld [vmem:[%s4250_s17 + $0x8] sm:$0xff]  ;;  %v779_v24 = vld [vmem:[%s4250_s17] sm:$0xff]  ;;  %s4093_s22 = smov 32   ;;  %s4094_s28 = smov 64   ;;  %vm873_vm3 = vcmask 64512   ;;  %vm1900_vm4 = vcmask 130112  }
  0x3b   : > { %819 = vmatprep.subr.mxu0 %v784_v18  ;;  %3710 = vmatprep.mubr.msk.f32.mxu1 %vm4091_vm2, %v4090_v20  ;;  %s4095_s0 = smov 88   ;;  %s4096_s23 = smov 120   ;;  %vm2423_vm5 = vcmask 195712   ;;  %vm2946_vm6 = vcmask 261312  }
  0x3c   : > { %820 = vmatpush1.msra.mxu0 %v783_v19  ;;  %s4097_s19 = smov 24   ;;  %s4099_s17 = smov 112  }
  0x3d   : > { %821 = vmatprep.subr.mxu0 %v782_v21  ;;  %s4100_s25 = smov 80   ;;  %p3616_p3 = scmp.ne.s32.totalorder %s4079_s18, 1 }
  0x3e   : > { %v731_v2 = vld [vmem:[#allocation2] sm:$0xff]  ;;  %v732_v3 = vld [vmem:[#allocation2 + $0x8] sm:$0xff]  ;;  %822 = vmatpush1.msra.mxu0 %v781_v22  ;;  %s4725_s26 = scalar_lea.vmem %s4724_s2, %s4235_s30  ;;  %s4098_s2 = smov 56  }
  0x3f   : > { %v736_v4 = vsel %vm735_vm1, %v731_v2, 0.0  ;;  %v739_v5 = vsel %vm735_vm1, %v732_v3, 0.0  ;;  %823 = vmatprep.subr.mxu0 %v780_v23  ;;  %v3561_v32 = vld [vmem:[%s4725_s26] ss:$0 sm:$0xff]  ;;  %s4727_s27 = scalar_lea.vmem %s4726_s29, %s4235_s30  ;;  %s730_s26 = sld [smem:[#allocation4 + %s4079_s18]] }
  0x40   : > { %737 = vadd.xlane.f32.xlu0 %v736_v4  ;;  %824 = vmatpush1.msra.mxu0 %v779_v24  ;;  %v3562_v34 = vld [vmem:[%s4727_s27] ss:$0 sm:$0xff]  ;;  %s4101_s29 = smov 16   ;;  %s4102_s27 = smov 48  }
  0x41   : > { %3703 = vmatprep.subr.mxu0 %v4090_v20 }
  0x44   : > { %740 = vadd.xlane.f32.xlu0 %v739_v5 }
  0xc9   : > { %v738_v6 = vpop.xlane.xlu0 %737 }
  0xca   : > { %v743_v7 = vmul.f32 0.03125, %v738_v6 }
  0xcc   : > { %v745_v8 = vsub.f32 %v731_v2, %v743_v7 }
  0xcd   : > { %v741_v9 = vpop.xlane.xlu0 %740 }
  0xce   : > { %v744_v10 = vmul.f32 0.03125, %v741_v9  ;;  %v747_v11 = vmul.f32 %v745_v8, %v745_v8 }
  0xd0   : > { %v746_v12 = vsub.f32 %v732_v3, %v744_v10  ;;  %v749_v13 = vsel %vm735_vm1, %v747_v11, 0.0 }
  0xd1   : > { %750 = vadd.xlane.f32.xlu1 %v749_v13 }
  0xd2   : > { %v748_v14 = vmul.f32 %v746_v12, %v746_v12 }
  0xd4   : > { %v752_v15 = vsel %vm735_vm1, %v748_v14, 0.0 }
  0xd5   : > { %753 = vadd.xlane.f32.xlu1 %v752_v15 }
 0x15a   : > { %v751_v25 = vpop.xlane.xlu1 %750 }
 0x15b   : > { %v755_v26 = vmul.f32 0.03125, %v751_v25 }
 0x15d   : > { %v757_v27 = vadd.f32 1e-05, %v755_v26 }
 0x15e   : > { %v754_v28 = vpop.xlane.xlu1 %753 }
 0x15f   : > { %3940 = vrsqrt.f32 %v757_v27  ;;  %v756_v29 = vmul.f32 0.03125, %v754_v28 }
 0x161   : > { %v758_v30 = vadd.f32 1e-05, %v756_v29 }
 0x163   : > { %3942 = vrsqrt.f32 %v758_v30  ;;  %v4396_v30 = vstv %s730_s26 }
 0x16c   : > { %v3941_v31 = vpop.eup %3940 }
 0x16d   : > { %v761_v33 = vmul.f32 %v3941_v31, %v745_v8 }
 0x16f   : > { %v769_v35 = vmul.f32 %v3561_v32, %v761_v33 }
 0x170   : > { %v3943_v36 = vpop.eup %3942 }
 0x171   : > { %v777_v37 = vadd.f32 %v3562_v34, %v769_v35  ;;  %v762_v38 = vmul.f32 %v3943_v36, %v746_v12 }
 0x173   : > { %3563 = vmatmul.mubr.msk.f32.vlgmr.msra.gmra.mxu0 %vm735_vm1, %v777_v37  ;;  %v770_v39 = vmul.f32 %v3561_v32, %v762_v38 }
 0x174   : > { %863 = vmatprep.mubr.f32.mxu0 %v4090_v20 }
 0x175   : > { %v778_v40 = vadd.f32 %v3562_v34, %v770_v39 }
 0x177   : > { %3564 = vmatmul.mubr.msk.f32.gmra.mxu0 %vm735_vm1, %v778_v40 }
 0x178   : > { %3705 = vmatprep.mubr.msk.f32.mxu0 %vm4091_vm2, %v4090_v20 }
 0x233   : > { %v4335_v41 = vpop.f32.mrf.mxu0 }
 0x234   : > { %871 = vrot.lane.b32.xlu1 %v4335_v41, %s4092_s5 }
 0x235   : > { %v4338_v42 = vpop.f32.mrf.mxu0 }
 0x237   : > { %v4340_v43 = vpop.f32.mrf.mxu0 }
 0x238   : > { %1027 = vrot.lane.b32.xlu1 %v4335_v41, %s4093_s22  ;;  %949 = vrot.lane.b32.xlu0 %v4340_v43, %s4092_s5  ;;  %s4103_s5 = smov 104  }
 0x239   : > { %v4364_v50 = vpop.f32.mrf.mxu0 }
 0x23c   : > { %1105 = vrot.lane.b32.xlu1 %v4340_v43, %s4093_s22  ;;  %1025 = vrot.lane.b32.xlu0 %v4335_v41, %s4094_s28  ;;  %s4104_s22 = smov 72  }
 0x240   : > { %1103 = vrot.lane.b32.xlu1 %v4340_v43, %s4094_s28  ;;  %s4105_s28 = smov 8  }
 0x2a6   : > { %v872_v44 = vpop.permute.xlu1 %871 }
 0x2a7   : > { %3704 = vmatpush3.xpose.msk.msra.mxu0 %vm873_vm3, %v872_v44 }
 0x2a8   : > { %3718 = vmatprep.subr.mxu0 %v4090_v20 }
 0x2aa   : > { %v950_v45 = vpop.permute.xlu0 %949  ;;  %3706 = vmatmul.mubr.msk.f32.vlgmr.msra.gmra.mxu0 %vm873_vm3, %v4335_v41  ;;  %v1028_v46 = vpop.permute.xlu1 %1027 }
 0x2ab   : > { %3709 = vmatpush3.xpose.msk.msra.mxu1 %vm873_vm3, %v950_v45  ;;  %3720 = vmatprep.mubr.msk.f32.mxu0 %vm4091_vm2, %v4090_v20 }
 0x2ac   : > { %3713 = vmatprep.subr.mxu1 %v4090_v20 }
 0x2ae   : > { %3711 = vmatmul.mubr.msk.f32.vlgmr.msra.gmra.mxu1 %vm873_vm3, %v4340_v43  ;;  %v1106_v47 = vpop.permute.xlu1 %1105  ;;  %v1026_v48 = vpop.permute.xlu0 %1025 }
 0x2af   : > { %3714 = vmatpush3.xpose.msk.msra.mxu1 %vm873_vm3, %v1028_v46  ;;  %3719 = vmatpush3.xpose.msk.msra.mxu0 %vm873_vm3, %v1106_v47 }
 0x2b0   : > { %3715 = vmatprep.mubr.msk.f32.mxu1 %vm4091_vm2, %v4090_v20  ;;  %3723 = vmatprep.subr.mxu1 %v4090_v20 }
 0x2b1   : > { %3728 = vmatprep.subr.mxu0 %v4090_v20 }
 0x2b2   : > { %3716 = vmatmul.mubr.msk.f32.vlgmr.msra.gmra.mxu1 %vm873_vm3, %v1026_v48  ;;  %v1104_v49 = vpop.permute.xlu1 %1103 }
 0x2b3   : > { %3721 = vmatmul.mubr.msk.f32.vlgmr.msra.gmra.mxu0 %vm873_vm3, %v1104_v49  ;;  %3724 = vmatpush3.msra.mxu1 %v4338_v42 }
 0x2b4   : > { %3729 = vmatpush3.msra.mxu0 %v4364_v50  ;;  %3725 = vmatprep.mubr.msk.f32.mxu1 %vm4091_vm2, %v4090_v20 }
 0x2b5   : > { %3733 = vmatprep.subr.mxu1 %v4090_v20  ;;  %3730 = vmatprep.mubr.msk.f32.mxu0 %vm4091_vm2, %v4090_v20 }
 0x2b6   : > { %3738 = vmatprep.subr.mxu0 %v4090_v20 }
 0x36a   : > { %v944_v51 = vpop.f32.mrf.mxu0 }
 0x36b   : > { %v1181_v52 = vsel %vm873_vm3, %v944_v51, -inf }
 0x36c   : > { %1182 = vmax.xlane.f32.xlu0 %v1181_v52  ;;  %v3707_v53 = vpop.f32.mrf.mxu0 }
 0x36e   : > { %v1021_v54 = vpop.f32.mrf.mxu1 }
 0x36f   : > { %v1184_v62 = vsel %vm873_vm3, %v1021_v54, -inf }
 0x370   : > { %v3712_v55 = vpop.f32.mrf.mxu1 }
 0x372   : > { %v1099_v56 = vpop.f32.mrf.mxu1 }
 0x373   : > { %v1177_v57 = vpop.f32.mrf.mxu0  ;;  %v1203_v58 = vsel %vm873_vm3, %v1099_v56, -inf }
 0x374   : > { %1204 = vmax.xlane.f32.xlu0 %v1203_v58  ;;  %v3717_v59 = vpop.f32.mrf.mxu1  ;;  %v1206_v60 = vsel %vm873_vm3, %v1177_v57, -inf }
 0x375   : > { %1207 = vmax.xlane.f32.xlu1 %v1206_v60  ;;  %v3722_v61 = vpop.f32.mrf.mxu0 }
 0x378   : > { %1185 = vmax.xlane.f32.xlu0 %v1184_v62 }
 0x3f5   : > { %v1183_v63 = vpop.xlane.xlu0 %1182 }
 0x3f6   : > { %v1187_v0 = vsub.f32 %v944_v51, %v1183_v63 }
 0x3f8   : > { %v1189_v5 = vmul.f32 1.442695, %v1187_v0 }
 0x3fd   : > { %v1205_v1 = vpop.xlane.xlu0 %1204 }
 0x3fe   : > { %v1209_v2 = vsub.f32 %v1099_v56, %v1205_v1  ;;  %v1208_v3 = vpop.xlane.xlu1 %1207 }
 0x3ff   : > { %v1210_v4 = vsub.f32 %v1177_v57, %v1208_v3 }
 0x400   : > { %v1211_v6 = vmul.f32 1.442695, %v1209_v2 }
 0x401   : > { %v1213_v7 = vmul.f32 1.442695, %v1210_v4  ;;  %v1186_v8 = vpop.xlane.xlu0 %1185 }
 0x402   : > { %3944 = vpow2.f32 %v1211_v6  ;;  %v1188_v9 = vsub.f32 %v1021_v54, %v1186_v8 }
 0x403   : > { %3946 = vpow2.f32 %v1213_v7 }
 0x404   : > { %3948 = vpow2.f32 %v1189_v5  ;;  %v1191_v10 = vmul.f32 1.442695, %v1188_v9 }
 0x406   : > { %3950 = vpow2.f32 %v1191_v10 }
 0x40f   : > { %v3945_v11 = vpop.eup %3944 }
 0x410   : > { %v3947_v12 = vpop.eup %3946  ;;  %v1215_v13 = vsel %vm873_vm3, %v3945_v11, 0.0 }
 0x411   : > { %v3949_v14 = vpop.eup %3948  ;;  %1216 = vadd.xlane.f32.xlu0 %v1215_v13  ;;  %v1218_v15 = vsel %vm873_vm3, %v3947_v12, 0.0 }
 0x412   : > { %1219 = vadd.xlane.f32.xlu1 %v1218_v15  ;;  %v1193_v17 = vsel %vm873_vm3, %v3949_v14, 0.0 }
 0x413   : > { %v3951_v16 = vpop.eup %3950 }
 0x414   : > { %v1196_v18 = vsel %vm873_vm3, %v3951_v16, 0.0 }
 0x415   : > { %1194 = vadd.xlane.f32.xlu0 %v1193_v17 }
 0x416   : > { %1197 = vadd.xlane.f32.xlu1 %v1196_v18 }
 0x427   : > { %1458 = vrot.lane.b32.xlu1 %v4340_v43, %s4095_s0 }
 0x42b   : > { %1380 = vrot.lane.b32.xlu0 %v4335_v41, %s4095_s0  ;;  %1378 = vrot.lane.b32.xlu1 %v4335_v41, %s4096_s23  ;;  %s4106_s0 = smov 40  }
 0x42f   : > { %1536 = vrot.lane.b32.xlu0 %v4335_v41, %s4097_s19  ;;  %1456 = vrot.lane.b32.xlu1 %v4340_v43, %s4096_s23 }
 0x433   : > { %1534 = vrot.lane.b32.xlu0 %v4335_v41, %s4098_s2  ;;  %1614 = vrot.lane.b32.xlu1 %v4340_v43, %s4097_s19 }
 0x437   : > { %1612 = vrot.lane.b32.xlu1 %v4340_v43, %s4098_s2 }
 0x49a   : > { %v1217_v19 = vpop.xlane.xlu0 %1216 }
 0x49b   : > { %3952 = vrcp.f32 %v1217_v19  ;;  %v1220_v21 = vpop.xlane.xlu1 %1219 }
 0x49c   : > { %3954 = vrcp.f32 %v1220_v21 }
 0x49e   : > { %v1195_v22 = vpop.xlane.xlu0 %1194 }
 0x49f   : > { %3956 = vrcp.f32 %v1195_v22  ;;  %v1198_v23 = vpop.xlane.xlu1 %1197 }
 0x4a0   : > { %3958 = vrcp.f32 %v1198_v23 }
 0x4a2   : > { %v1381_v32 = vpop.permute.xlu0 %1380 }
 0x4a3   : > { %v1459_v24 = vpop.permute.xlu1 %1458 }
 0x4a6   : > { %v1537_v44 = vpop.permute.xlu0 %1536 }
 0x4a7   : > { %v1379_v25 = vpop.permute.xlu1 %1378 }
 0x4a8   : > { %v3953_v26 = vpop.eup %3952 }
 0x4a9   : > { %v3955_v27 = vpop.eup %3954  ;;  %v1223_v28 = vmul.f32 %v3953_v26, %v3945_v11 }
 0x4aa   : > { %v1224_v29 = vmul.f32 %v3955_v27, %v3947_v12  ;;  %v1535_v46 = vpop.permute.xlu0 %1534 }
 0x4ab   : > { %v1457_v34 = vpop.permute.xlu1 %1456  ;;  %v1226_v36 = vmul.f32 %v4396_v30, %v1223_v28 }
 0x4ac   : > { %v3957_v31 = vpop.eup %3956  ;;  %v1227_v38 = vmul.f32 %v4396_v30, %v1224_v29 }
 0x4ad   : > { %v3959_v33 = vpop.eup %3958  ;;  %v1201_v35 = vmul.f32 %v3957_v31, %v3949_v14 }
 0x4ae   : > { %v1202_v37 = vmul.f32 %v3959_v33, %v3951_v16 }
 0x4af   : > { %v1228_v39 = vsub.f32 %v1201_v35, %v1226_v36  ;;  %v1615_v45 = vpop.permute.xlu1 %1614 }
 0x4b0   : > { %v1229_v40 = vsub.f32 %v1202_v37, %v1227_v38 }
 0x4b1   : > { %3726 = vmatmul.mubr.msk.f32.vlgmr.msra.gmra.mxu1 %vm873_vm3, %v1228_v39 }
 0x4b2   : > { %3734 = vmatpush3.xpose.msk.msra.mxu1 %vm873_vm3, %v1381_v32  ;;  %3731 = vmatmul.mubr.msk.f32.vlgmr.msra.gmra.mxu0 %vm873_vm3, %v1229_v40 }
 0x4b3   : > { %3739 = vmatpush3.xpose.msk.msra.mxu0 %vm873_vm3, %v1459_v24  ;;  %3735 = vmatprep.mubr.msk.f32.mxu1 %vm4091_vm2, %v4090_v20  ;;  %v1613_v47 = vpop.permute.xlu1 %1612 }
 0x4b4   : > { %3743 = vmatprep.subr.mxu1 %v4090_v20  ;;  %3740 = vmatprep.mubr.msk.f32.mxu0 %vm4091_vm2, %v4090_v20 }
 0x4b5   : > { %3736 = vmatmul.mubr.msk.f32.vlgmr.msra.gmra.mxu1 %vm873_vm3, %v1379_v25  ;;  %3748 = vmatprep.subr.mxu0 %v4090_v20 }
 0x4b6   : > { %3744 = vmatpush3.xpose.msk.msra.mxu1 %vm873_vm3, %v1537_v44  ;;  %3741 = vmatmul.mubr.msk.f32.vlgmr.msra.gmra.mxu0 %vm873_vm3, %v1457_v34 }
 0x4b7   : > { %3749 = vmatpush3.xpose.msk.msra.mxu0 %vm873_vm3, %v1615_v45  ;;  %3745 = vmatprep.mubr.msk.f32.mxu1 %vm4091_vm2, %v4090_v20 }
 0x4b8   : > { %3750 = vmatprep.mubr.msk.f32.mxu0 %vm4091_vm2, %v4090_v20  ;;  %3753 = vmatprep.subr.mxu1 %v4090_v20 }
 0x4b9   : > { %3746 = vmatmul.mubr.msk.f32.vlgmr.msra.gmra.mxu1 %vm873_vm3, %v1535_v46  ;;  %3758 = vmatprep.subr.mxu0 %v4090_v20 }
 0x4ba   : > { %3751 = vmatmul.mubr.msk.f32.vlgmr.msra.gmra.mxu0 %vm873_vm3, %v1613_v47  ;;  %3755 = vmatprep.mubr.msk.f32.mxu1 %vm4091_vm2, %v4090_v20 }
 0x4bb   : > { %3760 = vmatprep.mubr.msk.f32.mxu0 %vm4091_vm2, %v4090_v20 }
 0x571   : > { %v1299_v48 = vpop.f32.mrf.mxu1 }
 0x572   : > { %1376 = vst.msk [vmem:[#allocation3] sm:$0xff] %vm873_vm3, %v1299_v48  ;;  %v1372_v49 = vpop.f32.mrf.mxu0 }
 0x573   : > { %1377 = vst.msk [vmem:[#allocation3 + $0x8] sm:$0xff] %vm873_vm3, %v1372_v49  ;;  %v3727_v51 = vpop.f32.mrf.mxu1 }
 0x574   : > { %v3732_v52 = vpop.f32.mrf.mxu0 }
 0x575   : > { %v1452_v53 = vpop.f32.mrf.mxu1 }
 0x576   : > { %v1530_v54 = vpop.f32.mrf.mxu0  ;;  %v1690_v55 = vsel %vm873_vm3, %v1452_v53, -inf }
 0x577   : > { %1691 = vmax.xlane.f32.xlu0 %v1690_v55  ;;  %v3737_v56 = vpop.f32.mrf.mxu1  ;;  %v1693_v0 = vsel %vm873_vm3, %v1530_v54, -inf }
 0x578   : > { %v3742_v57 = vpop.f32.mrf.mxu0 }
 0x579   : > { %v1608_v58 = vpop.f32.mrf.mxu1 }
 0x57a   : > { %v1686_v59 = vpop.f32.mrf.mxu0  ;;  %v1712_v60 = vsel %vm873_vm3, %v1608_v58, -inf }
 0x57b   : > { %1713 = vmax.xlane.f32.xlu0 %v1712_v60  ;;  %v3747_v61 = vpop.f32.mrf.mxu1  ;;  %v1715_v62 = vsel %vm873_vm3, %v1686_v59, -inf }
 0x57c   : > { %1716 = vmax.xlane.f32.xlu1 %v1715_v62  ;;  %v3752_v63 = vpop.f32.mrf.mxu0 }
 0x57f   : > { %1694 = vmax.xlane.f32.xlu0 %v1693_v0 }
 0x600   : > { %v1692_v1 = vpop.xlane.xlu0 %1691 }
 0x601   : > { %v1696_v2 = vsub.f32 %v1452_v53, %v1692_v1 }
 0x603   : > { %v1698_v3 = vmul.f32 1.442695, %v1696_v2 }
 0x604   : > { %v1714_v4 = vpop.xlane.xlu0 %1713 }
 0x605   : > { %3960 = vpow2.f32 %v1698_v3  ;;  %v1718_v5 = vsub.f32 %v1608_v58, %v1714_v4  ;;  %v1717_v6 = vpop.xlane.xlu1 %1716 }
 0x606   : > { %v1719_v8 = vsub.f32 %v1686_v59, %v1717_v6 }
 0x607   : > { %v1720_v7 = vmul.f32 1.442695, %v1718_v5 }
 0x608   : > { %v1695_v9 = vpop.xlane.xlu0 %1694  ;;  %v1722_v11 = vmul.f32 1.442695, %v1719_v8 }
 0x609   : > { %3962 = vpow2.f32 %v1720_v7  ;;  %v1697_v10 = vsub.f32 %v1530_v54, %v1695_v9 }
 0x60b   : > { %v1700_v12 = vmul.f32 1.442695, %v1697_v10 }
 0x60d   : > { %3964 = vpow2.f32 %v1700_v12 }
 0x60e   : > { %3966 = vpow2.f32 %v1722_v11 }
 0x612   : > { %v3961_v13 = vpop.eup %3960 }
 0x613   : > { %v1702_v14 = vsel %vm873_vm3, %v3961_v13, 0.0 }
 0x614   : > { %1703 = vadd.xlane.f32.xlu0 %v1702_v14 }
 0x616   : > { %v3963_v15 = vpop.eup %3962 }
 0x617   : > { %v1724_v16 = vsel %vm873_vm3, %v3963_v15, 0.0 }
 0x618   : > { %1725 = vadd.xlane.f32.xlu0 %v1724_v16 }
 0x61a   : > { %v3965_v17 = vpop.eup %3964 }
 0x61b   : > { %v1705_v18 = vsel %vm873_vm3, %v3965_v17, 0.0  ;;  %v3967_v19 = vpop.eup %3966 }
 0x61c   : > { %1706 = vadd.xlane.f32.xlu1 %v1705_v18  ;;  %v1727_v21 = vsel %vm873_vm3, %v3967_v19, 0.0 }
 0x620   : > { %1728 = vadd.xlane.f32.xlu1 %v1727_v21 }
 0x62e   : > { %1739 = vrot.lane.b32.xlu0 %v4338_v42, %s4096_s23 }
 0x631   : > { %1816 = vrot.lane.b32.xlu1 %v4364_v50, %s4096_s23  ;;  %s4728_s23 = sld [smem:[#allocation13_spill]] }
 0x632   : > { %1903 = vrot.lane.b32.xlu0 %v4335_v41, %s4099_s17 }
 0x635   : > { %1905 = vrot.lane.b32.xlu1 %v4335_v41, %s4100_s25 }
 0x636   : > { %2061 = vrot.lane.b32.xlu0 %v4335_v41, %s4101_s29 }
 0x639   : > { %1983 = vrot.lane.b32.xlu1 %v4340_v43, %s4100_s25  ;;  %s4729_s25 = scalar_lea.vmem %s4695_s8, %s4235_s30 }
 0x63a   : > { %2059 = vrot.lane.b32.xlu0 %v4335_v41, %s4102_s27 }
 0x63d   : > { %1981 = vrot.lane.b32.xlu1 %v4340_v43, %s4099_s17 }
 0x641   : > { %2139 = vrot.lane.b32.xlu1 %v4340_v43, %s4101_s29 }
 0x645   : > { %2137 = vrot.lane.b32.xlu1 %v4340_v43, %s4102_s27 }
 0x69d   : > { %v1704_v22 = vpop.xlane.xlu0 %1703 }
 0x69e   : > { %3968 = vrcp.f32 %v1704_v22 }
 0x6a1   : > { %v1726_v23 = vpop.xlane.xlu0 %1725 }
 0x6a2   : > { %3970 = vrcp.f32 %v1726_v23 }
 0x6a5   : > { %v1707_v24 = vpop.xlane.xlu1 %1706  ;;  %v1740_v25 = vpop.permute.xlu0 %1739 }
 0x6a6   : > { %3754 = vmatpush3.msra.mxu1 %v1740_v25  ;;  %3972 = vrcp.f32 %v1707_v24 }
 0x6a7   : > { %3763 = vmatprep.subr.mxu1 %v4090_v20 }
 0x6a9   : > { %v1729_v26 = vpop.xlane.xlu1 %1728  ;;  %v1904_v32 = vpop.permute.xlu0 %1903 }
 0x6aa   : > { %3974 = vrcp.f32 %v1729_v26 }
 0x6ab   : > { %v3969_v28 = vpop.eup %3968 }
 0x6ac   : > { %v1710_v34 = vmul.f32 %v3969_v28, %v3961_v13 }
 0x6ad   : > { %v1817_v27 = vpop.permute.xlu1 %1816  ;;  %v2062_v40 = vpop.permute.xlu0 %2061 }
 0x6ae   : > { %3759 = vmatpush3.msra.mxu0 %v1817_v27 }
 0x6af   : > { %v3971_v29 = vpop.eup %3970  ;;  %3768 = vmatprep.subr.mxu0 %v4090_v20 }
 0x6b0   : > { %v1732_v31 = vmul.f32 %v3971_v29, %v3963_v15 }
 0x6b1   : > { %v1906_v33 = vpop.permute.xlu1 %1905  ;;  %v2060_v49 = vpop.permute.xlu0 %2059 }
 0x6b2   : > { %v1734_v35 = vmul.f32 %v1732_v31, %v4396_v30 }
 0x6b3   : > { %v3973_v38 = vpop.eup %3972 }
 0x6b4   : > { %v1736_v36 = vsub.f32 %v1710_v34, %v1734_v35  ;;  %v1711_v46 = vmul.f32 %v3973_v38, %v3965_v17 }
 0x6b5   : > { %v1984_v37 = vpop.permute.xlu1 %1983 }
 0x6b6   : > { %3756 = vmatmul.mubr.msk.f32.vlgmr.msra.gmra.mxu1 %vm873_vm3, %v1736_v36 }
 0x6b7   : > { %v3975_v39 = vpop.eup %3974  ;;  %3764 = vmatpush3.xpose.msk.msra.mxu1 %vm873_vm3, %v1906_v33  ;;  %3765 = vmatprep.mubr.msk.f32.mxu1 %vm4091_vm2, %v4090_v20 }
 0x6b8   : > { %v1733_v44 = vmul.f32 %v3975_v39, %v3967_v19  ;;  %3773 = vmatprep.subr.mxu1 %v4090_v20 }
 0x6b9   : > { %v1982_v45 = vpop.permute.xlu1 %1981 }
 0x6ba   : > { %3766 = vmatmul.mubr.msk.f32.vlgmr.msra.gmra.mxu1 %vm873_vm3, %v1904_v32  ;;  %v1735_v47 = vmul.f32 %v1733_v44, %v4396_v30 }
 0x6bb   : > { %3774 = vmatpush3.xpose.msk.msra.mxu1 %vm873_vm3, %v2062_v40  ;;  %3775 = vmatprep.mubr.msk.f32.mxu1 %vm4091_vm2, %v4090_v20 }
 0x6bc   : > { %v1737_v48 = vsub.f32 %v1711_v46, %v1735_v47  ;;  %3783 = vmatprep.subr.mxu1 %v4090_v20 }
 0x6bd   : > { %v2140_v51 = vpop.permute.xlu1 %2139 }
 0x6be   : > { %3761 = vmatmul.mubr.msk.f32.vlgmr.msra.gmra.mxu0 %vm873_vm3, %v1737_v48  ;;  %3776 = vmatmul.mubr.msk.f32.vlgmr.msra.gmra.mxu1 %vm873_vm3, %v2060_v49 }
 0x6bf   : > { %3769 = vmatpush3.xpose.msk.msra.mxu0 %vm873_vm3, %v1984_v37  ;;  %3770 = vmatprep.mubr.msk.f32.mxu0 %vm4091_vm2, %v4090_v20 }
 0x6c0   : > { %3778 = vmatprep.subr.mxu0 %v4090_v20  ;;  %3785 = vmatprep.mubr.msk.f32.mxu1 %vm4091_vm2, %v4090_v20 }
 0x6c1   : > { %v2138_v52 = vpop.permute.xlu1 %2137 }
 0x6c2   : > { %3771 = vmatmul.mubr.msk.f32.vlgmr.msra.gmra.mxu0 %vm873_vm3, %v1982_v45 }
 0x6c3   : > { %3779 = vmatpush3.xpose.msk.msra.mxu0 %vm873_vm3, %v2140_v51  ;;  %3780 = vmatprep.mubr.msk.f32.mxu0 %vm4091_vm2, %v4090_v20 }
 0x6c4   : > { %3788 = vmatprep.subr.mxu0 %v4090_v20 }
 0x6c6   : > { %3781 = vmatmul.mubr.msk.f32.vlgmr.msra.gmra.mxu0 %vm873_vm3, %v2138_v52 }
 0x6c7   : > { %3790 = vmatprep.mubr.msk.f32.mxu0 %vm4091_vm2, %v4090_v20 }
 0x776   : > { %v4482_v53 = vpop.f32.mrf.mxu1 }
 0x778   : > { %v3757_v54 = vpop.f32.mrf.mxu1 }
 0x77a   : > { %v1977_v55 = vpop.f32.mrf.mxu1 }
 0x77b   : > { %v2215_v56 = vsel %vm873_vm3, %v1977_v55, -inf }
 0x77c   : > { %2216 = vmax.xlane.f32.xlu0 %v2215_v56  ;;  %v3767_v57 = vpop.f32.mrf.mxu1 }
 0x77e   : > { %v4485_v58 = vpop.f32.mrf.mxu0  ;;  %v2133_v59 = vpop.f32.mrf.mxu1 }
 0x77f   : > { %v2237_v60 = vsel %vm873_vm3, %v2133_v59, -inf }
 0x780   : > { %v3762_v61 = vpop.f32.mrf.mxu0  ;;  %2238 = vmax.xlane.f32.xlu0 %v2237_v60  ;;  %v3777_v62 = vpop.f32.mrf.mxu1 }
 0x782   : > { %v2055_v63 = vpop.f32.mrf.mxu0 }
 0x783   : > { %v2218_v0 = vsel %vm873_vm3, %v2055_v63, -inf }
 0x784   : > { %v3772_v1 = vpop.f32.mrf.mxu0  ;;  %2219 = vmax.xlane.f32.xlu0 %v2218_v0 }
 0x786   : > { %v2211_v2 = vpop.f32.mrf.mxu0 }
 0x787   : > { %v2240_v3 = vsel %vm873_vm3, %v2211_v2, -inf }
 0x788   : > { %2241 = vmax.xlane.f32.xlu1 %v2240_v3  ;;  %v3782_v4 = vpop.f32.mrf.mxu0 }
 0x805   : > { %v2217_v5 = vpop.xlane.xlu0 %2216 }
 0x806   : > { %v2221_v6 = vsub.f32 %v1977_v55, %v2217_v5 }
 0x808   : > { %v2223_v7 = vmul.f32 1.442695, %v2221_v6 }
 0x809   : > { %v2239_v8 = vpop.xlane.xlu0 %2238 }
 0x80a   : > { %3976 = vpow2.f32 %v2223_v7  ;;  %v2243_v9 = vsub.f32 %v2133_v59, %v2239_v8 }
 0x80c   : > { %v2245_v10 = vmul.f32 1.442695, %v2243_v9 }
 0x80d   : > { %v2220_v11 = vpop.xlane.xlu0 %2219 }
 0x80e   : > { %3978 = vpow2.f32 %v2245_v10  ;;  %v2222_v12 = vsub.f32 %v2055_v63, %v2220_v11 }
 0x810   : > { %v2225_v13 = vmul.f32 1.442695, %v2222_v12 }
 0x811   : > { %v2242_v14 = vpop.xlane.xlu1 %2241 }
 0x812   : > { %3980 = vpow2.f32 %v2225_v13  ;;  %v2244_v15 = vsub.f32 %v2211_v2, %v2242_v14 }
 0x814   : > { %v2247_v16 = vmul.f32 1.442695, %v2244_v15 }
 0x816   : > { %3982 = vpow2.f32 %v2247_v16 }
 0x817   : > { %v3977_v17 = vpop.eup %3976 }
 0x818   : > { %v2227_v18 = vsel %vm873_vm3, %v3977_v17, 0.0 }
 0x819   : > { %2228 = vadd.xlane.f32.xlu0 %v2227_v18 }
 0x81b   : > { %v3979_v19 = vpop.eup %3978 }
 0x81c   : > { %v2249_v21 = vsel %vm873_vm3, %v3979_v19, 0.0 }
 0x81d   : > { %2250 = vadd.xlane.f32.xlu0 %v2249_v21 }
 0x81f   : > { %v3981_v22 = vpop.eup %3980 }
 0x820   : > { %v2230_v23 = vsel %vm873_vm3, %v3981_v22, 0.0 }
 0x821   : > { %2231 = vadd.xlane.f32.xlu1 %v2230_v23 }
 0x823   : > { %v3983_v24 = vpop.eup %3982 }
 0x824   : > { %v2252_v25 = vsel %vm873_vm3, %v3983_v24, 0.0 }
 0x825   : > { %2253 = vadd.xlane.f32.xlu1 %v2252_v25 }
 0x833   : > { %2263 = vrot.lane.b32.xlu0 %v4338_v42, %s4099_s17 }
 0x836   : > { %2339 = vrot.lane.b32.xlu1 %v4364_v50, %s4099_s17 }
 0x837   : > { %2426 = vrot.lane.b32.xlu0 %v4335_v41, %s4103_s5 }
 0x83a   : > { %2428 = vrot.lane.b32.xlu1 %v4335_v41, %s4104_s22 }
 0x83b   : > { %2584 = vrot.lane.b32.xlu0 %v4335_v41, %s4105_s28 }
 0x83e   : > { %2506 = vrot.lane.b32.xlu1 %v4340_v43, %s4104_s22 }
 0x83f   : > { %2582 = vrot.lane.b32.xlu0 %v4335_v41, %s4106_s0 }
 0x842   : > { %2504 = vrot.lane.b32.xlu1 %v4340_v43, %s4103_s5 }
 0x846   : > { %2662 = vrot.lane.b32.xlu1 %v4340_v43, %s4105_s28 }
 0x84a   : > { %2660 = vrot.lane.b32.xlu1 %v4340_v43, %s4106_s0 }
 0x8a2   : > { %v2229_v26 = vpop.xlane.xlu0 %2228 }
 0x8a3   : > { %3984 = vrcp.f32 %v2229_v26 }
 0x8a6   : > { %v2251_v27 = vpop.xlane.xlu0 %2250 }
 0x8a7   : > { %3986 = vrcp.f32 %v2251_v27 }
 0x8aa   : > { %v2232_v28 = vpop.xlane.xlu1 %2231  ;;  %v2264_v29 = vpop.permute.xlu0 %2263 }
 0x8ab   : > { %3784 = vmatpush3.msra.mxu1 %v2264_v29  ;;  %3988 = vrcp.f32 %v2232_v28 }
 0x8ac   : > { %3793 = vmatprep.subr.mxu1 %v4090_v20 }
 0x8ae   : > { %v2254_v31 = vpop.xlane.xlu1 %2253  ;;  %v2427_v43 = vpop.permute.xlu0 %2426 }
 0x8af   : > { %3990 = vrcp.f32 %v2254_v31 }
 0x8b0   : > { %v3985_v32 = vpop.eup %3984 }
 0x8b1   : > { %v2235_v36 = vmul.f32 %v3985_v32, %v3977_v17 }
 0x8b2   : > { %v2340_v41 = vpop.permute.xlu1 %2339  ;;  %v2585_v45 = vpop.permute.xlu0 %2584 }
 0x8b3   : > { %3789 = vmatpush3.msra.mxu0 %v2340_v41 }
 0x8b4   : > { %v3987_v33 = vpop.eup %3986  ;;  %3798 = vmatprep.subr.mxu0 %v4090_v20 }
 0x8b5   : > { %v2257_v34 = vmul.f32 %v3987_v33, %v3979_v19 }
 0x8b6   : > { %v2429_v35 = vpop.permute.xlu1 %2428  ;;  %v2583_v52 = vpop.permute.xlu0 %2582 }
 0x8b7   : > { %v2259_v37 = vmul.f32 %v2257_v34, %v4396_v30 }
 0x8b8   : > { %v3989_v40 = vpop.eup %3988 }
 0x8b9   : > { %v2261_v38 = vsub.f32 %v2235_v36, %v2259_v37  ;;  %v2236_v48 = vmul.f32 %v3989_v40, %v3981_v22 }
 0x8ba   : > { %v2507_v39 = vpop.permute.xlu1 %2506 }
 0x8bb   : > { %3786 = vmatmul.mubr.msk.f32.vlgmr.msra.gmra.mxu1 %vm873_vm3, %v2261_v38 }
 0x8bc   : > { %v3991_v44 = vpop.eup %3990  ;;  %3794 = vmatpush3.xpose.msk.msra.mxu1 %vm873_vm3, %v2429_v35  ;;  %3795 = vmatprep.mubr.msk.f32.mxu1 %vm4091_vm2, %v4090_v20 }
 0x8bd   : > { %v2258_v46 = vmul.f32 %v3991_v44, %v3983_v24  ;;  %3803 = vmatprep.subr.mxu1 %v4090_v20 }
 0x8be   : > { %v2505_v47 = vpop.permute.xlu1 %2504 }
 0x8bf   : > { %3796 = vmatmul.mubr.msk.f32.vlgmr.msra.gmra.mxu1 %vm873_vm3, %v2427_v43  ;;  %v2260_v49 = vmul.f32 %v2258_v46, %v4396_v30 }
 0x8c0   : > { %3804 = vmatpush3.xpose.msk.msra.mxu1 %vm873_vm3, %v2585_v45  ;;  %3805 = vmatprep.mubr.msk.f32.mxu1 %vm4091_vm2, %v4090_v20 }
 0x8c1   : > { %v2262_v51 = vsub.f32 %v2236_v48, %v2260_v49  ;;  %3813 = vmatprep.subr.mxu1 %v4090_v20 }
 0x8c2   : > { %v2663_v54 = vpop.permute.xlu1 %2662 }
 0x8c3   : > { %3791 = vmatmul.mubr.msk.f32.vlgmr.msra.gmra.mxu0 %vm873_vm3, %v2262_v51  ;;  %3806 = vmatmul.mubr.msk.f32.vlgmr.msra.gmra.mxu1 %vm873_vm3, %v2583_v52 }
 0x8c4   : > { %3799 = vmatpush3.xpose.msk.msra.mxu0 %vm873_vm3, %v2507_v39  ;;  %3800 = vmatprep.mubr.msk.f32.mxu0 %vm4091_vm2, %v4090_v20 }
 0x8c5   : > { %3808 = vmatprep.subr.mxu0 %v4090_v20  ;;  %3815 = vmatprep.mubr.msk.f32.mxu1 %vm4091_vm2, %v4090_v20 }
 0x8c6   : > { %v2661_v55 = vpop.permute.xlu1 %2660 }
 0x8c7   : > { %3801 = vmatmul.mubr.msk.f32.vlgmr.msra.gmra.mxu0 %vm873_vm3, %v2505_v47 }
 0x8c8   : > { %3809 = vmatpush3.xpose.msk.msra.mxu0 %vm873_vm3, %v2663_v54  ;;  %3810 = vmatprep.mubr.msk.f32.mxu0 %vm4091_vm2, %v4090_v20 }
 0x8c9   : > { %3818 = vmatprep.subr.mxu0 %v4090_v20 }
 0x8cb   : > { %3811 = vmatmul.mubr.msk.f32.vlgmr.msra.gmra.mxu0 %vm873_vm3, %v2661_v55 }
 0x8cc   : > { %3820 = vmatprep.mubr.msk.f32.mxu0 %vm4091_vm2, %v4090_v20 }
 0x97b   : > { %v2335_v56 = vpop.f32.mrf.mxu1 }
 0x97d   : > { %v3787_v57 = vpop.f32.mrf.mxu1 }
 0x97f   : > { %v2500_v59 = vpop.f32.mrf.mxu1 }
 0x980   : > { %v2738_v60 = vsel %vm873_vm3, %v2500_v59, -inf }
 0x981   : > { %2739 = vmax.xlane.f32.xlu0 %v2738_v60  ;;  %v3797_v61 = vpop.f32.mrf.mxu1 }
 0x983   : > { %v2411_v62 = vpop.f32.mrf.mxu0  ;;  %v2656_v63 = vpop.f32.mrf.mxu1 }
 0x984   : > { %v2760_v0 = vsel %vm873_vm3, %v2656_v63, -inf }
 0x985   : > { %v3792_v1 = vpop.f32.mrf.mxu0  ;;  %2761 = vmax.xlane.f32.xlu0 %v2760_v0  ;;  %v3807_v2 = vpop.f32.mrf.mxu1 }
 0x987   : > { %v2578_v3 = vpop.f32.mrf.mxu0 }
 0x988   : > { %v2741_v4 = vsel %vm873_vm3, %v2578_v3, -inf }
 0x989   : > { %v3802_v5 = vpop.f32.mrf.mxu0  ;;  %2742 = vmax.xlane.f32.xlu0 %v2741_v4 }
 0x98b   : > { %v2734_v20 = vpop.f32.mrf.mxu0 }
 0x98c   : > { %v2763_v6 = vsel %vm873_vm3, %v2734_v20, -inf }
 0x98d   : > { %2764 = vmax.xlane.f32.xlu1 %v2763_v6  ;;  %v3812_v7 = vpop.f32.mrf.mxu0  ;;  %v2998_v6 = vld [vmem:[%s4728_s23 + $0x18] sm:$0xff] }
 0x98e   : > { %v2997_v7 = vld [vmem:[%s4728_s23 + $0x10] sm:$0xff] }
 0xa0a   : > { %v2740_v8 = vpop.xlane.xlu0 %2739 }
 0xa0b   : > { %v2744_v9 = vsub.f32 %v2500_v59, %v2740_v8  ;;  %v2996_v8 = vld [vmem:[%s4728_s23 + $0x8] sm:$0xff] }
 0xa0d   : > { %v2746_v10 = vmul.f32 1.442695, %v2744_v9  ;;  %v2995_v9 = vld [vmem:[%s4728_s23] sm:$0xff] }
 0xa0e   : > { %v2762_v11 = vpop.xlane.xlu0 %2761 }
 0xa0f   : > { %3992 = vpow2.f32 %v2746_v10  ;;  %v2766_v12 = vsub.f32 %v2656_v63, %v2762_v11 }
 0xa11   : > { %v2768_v13 = vmul.f32 1.442695, %v2766_v12 }
 0xa12   : > { %v2743_v14 = vpop.xlane.xlu0 %2742 }
 0xa13   : > { %3994 = vpow2.f32 %v2768_v13  ;;  %v2745_v15 = vsub.f32 %v2578_v3, %v2743_v14 }
 0xa15   : > { %v2748_v16 = vmul.f32 1.442695, %v2745_v15 }
 0xa16   : > { %v2765_v17 = vpop.xlane.xlu1 %2764 }
 0xa17   : > { %3996 = vpow2.f32 %v2748_v16  ;;  %v2767_v18 = vsub.f32 %v2734_v20, %v2765_v17  ;;  %v3605_v17 = vld [vmem:[%s694_s24] ss:$0 sm:$0xff]  ;;  %s4730_s24 = scalar_lea.vmem %s4693_s6, %s4235_s30 }
 0xa19   : > { %v2770_v19 = vmul.f32 1.442695, %v2767_v18 }
 0xa1b   : > { %3998 = vpow2.f32 %v2770_v19  ;;  %v3606_v19 = vld [vmem:[%s4729_s25] ss:$0 sm:$0xff] }
 0xa1c   : > { %v3993_v21 = vpop.eup %3992 }
 0xa1d   : > { %v2750_v22 = vsel %vm873_vm3, %v3993_v21, 0.0 }
 0xa1e   : > { %2751 = vadd.xlane.f32.xlu0 %v2750_v22 }
 0xa20   : > { %v3995_v23 = vpop.eup %3994 }
 0xa21   : > { %v2772_v24 = vsel %vm873_vm3, %v3995_v23, 0.0 }
 0xa22   : > { %2773 = vadd.xlane.f32.xlu0 %v2772_v24 }
 0xa24   : > { %v3997_v25 = vpop.eup %3996 }
 0xa25   : > { %v2753_v26 = vsel %vm873_vm3, %v3997_v25, 0.0 }
 0xa26   : > { %2754 = vadd.xlane.f32.xlu1 %v2753_v26 }
 0xa28   : > { %v3999_v27 = vpop.eup %3998 }
 0xa29   : > { %v2775_v28 = vsel %vm873_vm3, %v3999_v27, 0.0 }
 0xa2a   : > { %2776 = vadd.xlane.f32.xlu1 %v2775_v28  ;;  %v3609_v28 = vld [vmem:[%s4730_s24] ss:$0 sm:$0xff] }
 0xa38   : > { %2786 = vrot.lane.b32.xlu0 %v4338_v42, %s4103_s5 }
 0xa3b   : > { %2862 = vrot.lane.b32.xlu1 %v4364_v50, %s4103_s5 }
 0xa3c   : > { %2417 = vrot.lane.b32.xlu0 %v2335_v56, %s4101_s29 }
 0xa3f   : > { %1894 = vrot.lane.b32.xlu1 %v4482_v53, %s4105_s28 }
 0xa43   : > { %1896 = vrot.lane.b32.xlu1 %v4485_v58, %s4105_s28 }
 0xa47   : > { %2419 = vrot.lane.b32.xlu1 %v2411_v62, %s4101_s29 }
 0xaa7   : > { %v2752_v29 = vpop.xlane.xlu0 %2751 }
 0xaa8   : > { %4000 = vrcp.f32 %v2752_v29  ;;  %v4016_v29 = vld [vmem:[#allocation2 + $0x8] sm:$0xff] }
 0xaab   : > { %v2774_v31 = vpop.xlane.xlu0 %2773 }
 0xaac   : > { %4002 = vrcp.f32 %v2774_v31 }
 0xaaf   : > { %v2755_v41 = vpop.xlane.xlu1 %2754  ;;  %v2787_v32 = vpop.permute.xlu0 %2786 }
 0xab0   : > { %3814 = vmatpush3.msra.mxu1 %v2787_v32  ;;  %4004 = vrcp.f32 %v2755_v41 }
 0xab3   : > { %v2777_v42 = vpop.xlane.xlu1 %2776  ;;  %v2418_v43 = vpop.permute.xlu0 %2417 }
 0xab4   : > { %4006 = vrcp.f32 %v2777_v42  ;;  %v4017_v42 = vld [vmem:[#allocation2] sm:$0xff] }
 0xab5   : > { %v4001_v33 = vpop.eup %4000 }
 0xab6   : > { %v2758_v35 = vmul.f32 %v4001_v33, %v3993_v21 }
 0xab7   : > { %v2863_v50 = vpop.permute.xlu1 %2862 }
 0xab8   : > { %3819 = vmatpush3.msra.mxu0 %v2863_v50 }
 0xab9   : > { %v4003_v34 = vpop.eup %4002  ;;  %3823 = vmatprep.subr.mxu0 %v2998_v6 }
 0xaba   : > { %v2780_v53 = vmul.f32 %v4003_v34, %v3995_v23 }
 0xabb   : > { %v1895_v58 = vpop.permute.xlu1 %1894 }
 0xabc   : > { %1901 = vst.msk [vmem:[#allocation3] sm:$0xff] %vm1900_vm4, %v1895_v58  ;;  %v2782_v36 = vmul.f32 %v2780_v53, %v4396_v30 }
 0xabd   : > { %2424 = vst.msk [vmem:[#allocation3] sm:$0xff] %vm2423_vm5, %v2418_v43  ;;  %v4005_v39 = vpop.eup %4004 }
 0xabe   : > { %v2784_v37 = vsub.f32 %v2758_v35, %v2782_v36  ;;  %v2759_v46 = vmul.f32 %v4005_v39, %v3997_v25 }
 0xabf   : > { %v1897_v38 = vpop.permute.xlu1 %1896 }
 0xac0   : > { %1902 = vst.msk [vmem:[#allocation3 + $0x8] sm:$0xff] %vm1900_vm4, %v1897_v38  ;;  %3816 = vmatmul.mubr.msk.f32.vlgmr.msra.gmra.mxu1 %vm873_vm3, %v2784_v37 }
 0xac1   : > { %v4007_v40 = vpop.eup %4006 }
 0xac2   : > { %v2781_v44 = vmul.f32 %v4007_v40, %v3999_v27 }
 0xac3   : > { %v2420_v45 = vpop.permute.xlu1 %2419 }
 0xac4   : > { %2425 = vst.msk [vmem:[#allocation3 + $0x8] sm:$0xff] %vm2423_vm5, %v2420_v45  ;;  %v2783_v47 = vmul.f32 %v2781_v44, %v4396_v30 }
 0xac6   : > { %v2785_v48 = vsub.f32 %v2759_v46, %v2783_v47  ;;  %v3138_v46 = vld [vmem:[%s4280_s15 + $0x18] sm:$0xff]  ;;  %v3137_v47 = vld [vmem:[%s4280_s15 + $0x10] sm:$0xff] }
 0xac8   : > { %3821 = vmatmul.mubr.msk.f32.vlgmr.msra.gmra.mxu0 %vm873_vm3, %v2785_v48  ;;  %v3136_v48 = vld [vmem:[%s4280_s15 + $0x8] sm:$0xff] }
 0xac9   : > { %3824 = vmatpush3.msra.mxu0 %v2998_v6  ;;  %v3610_v6 = vld [vmem:[%s700_s16] ss:$0 sm:$0xff] }
 0xaca   : > { %3825 = vmatprep.subr.mxu0 %v2997_v7 }
 0xacb   : > { %3826 = vmatpush3.msra.mxu0 %v2997_v7 }
 0xacc   : > { %3827 = vmatprep.subr.mxu0 %v2996_v8 }
 0xacd   : > { %3828 = vmatpush3.msra.mxu0 %v2996_v8 }
 0xace   : > { %3829 = vmatprep.subr.mxu0 %v2995_v9 }
 0xacf   : > { %3830 = vmatpush3.msra.mxu0 %v2995_v9 }
 0xad0   : > { %3834 = vmatprep.subr.mxu0 %v3138_v46 }
 0xb80   : > { %v2858_v49 = vpop.f32.mrf.mxu1 }
 0xb81   : > { %2940 = vrot.lane.b32.xlu0 %v2858_v49, %s4097_s19  ;;  %v3135_v49 = vld [vmem:[%s4280_s15] sm:$0xff] }
 0xb82   : > { %v3817_v51 = vpop.f32.mrf.mxu1 }
 0xb83   : > { %v3244_v51 = vld [vmem:[%s4290_s3 + $0x78] sm:$0xff] }
 0xb84   : > { %3845 = vmatprep.subr.mxu1 %v3244_v51 }
 0xb85   : > { %3846 = vmatpush3.msra.mxu1 %v3244_v51 }
 0xb88   : > { %v2934_v52 = vpop.f32.mrf.mxu0 }
 0xb89   : > { %2942 = vrot.lane.b32.xlu1 %v2934_v52, %s4097_s19  ;;  %v3243_v52 = vld [vmem:[%s4290_s3 + $0x70] sm:$0xff] }
 0xb8a   : > { %v3822_v54 = vpop.f32.mrf.mxu0  ;;  %3847 = vmatprep.subr.mxu1 %v3243_v52 }
 0xb8b   : > { %v3242_v54 = vld [vmem:[%s4290_s3 + $0x68] sm:$0xff]  ;;  %3848 = vmatpush3.msra.mxu1 %v3243_v52 }
 0xb8c   : > { %3849 = vmatprep.subr.mxu1 %v3242_v54 }
 0xb8d   : > { %3850 = vmatpush3.msra.mxu1 %v3242_v54 }
 0xbf3   : > { %v2941_v55 = vpop.permute.xlu0 %2940 }
 0xbf4   : > { %2947 = vst.msk [vmem:[#allocation3] sm:$0xff] %vm2946_vm6, %v2941_v55  ;;  %v3241_v55 = vld [vmem:[%s4290_s3 + $0x60] sm:$0xff] }
 0xbf5   : > { %3851 = vmatprep.subr.mxu1 %v3241_v55 }
 0xbf6   : > { %3852 = vmatpush3.msra.mxu1 %v3241_v55 }
 0xbfb   : > { %v2943_v56 = vpop.permute.xlu1 %2942  ;;  %v2949_v57 = vld [vmem:[#allocation3] sm:$0xff] }
 0xbfc   : > { %2948 = vst.msk [vmem:[#allocation3 + $0x8] sm:$0xff] %vm2946_vm6, %v2943_v56  ;;  %v2953_v59 = vsel %vm735_vm1, %v2949_v57, 0.0  ;;  %v3240_v56 = vld [vmem:[%s4290_s3 + $0x58] sm:$0xff] }
 0xbfd   : > { %2954 = vadd.xlane.f32.xlu0 %v2953_v59  ;;  %3853 = vmatprep.subr.mxu1 %v3240_v56  ;;  %v3238_v59 = vld [vmem:[%s4290_s3 + $0x48] sm:$0xff] }
 0xbfe   : > { %3854 = vmatpush3.msra.mxu1 %v3240_v56 }
 0xc03   : > { %v2950_v30 = vld [vmem:[#allocation3 + $0x8] sm:$0xff] }
 0xc04   : > { %v2956_v60 = vsel %vm735_vm1, %v2950_v30, 0.0 }
 0xc05   : > { %2957 = vadd.xlane.f32.xlu1 %v2956_v60  ;;  %v3236_v60 = vld [vmem:[%s4290_s3 + $0x38] sm:$0xff] }
 0xc86   : > { %v2955_v61 = vpop.xlane.xlu0 %2954 }
 0xc87   : > { %v2959_v62 = vmul.f32 0.03125, %v2955_v61  ;;  %v3235_v61 = vld [vmem:[%s4290_s3 + $0x30] sm:$0xff] }
 0xc89   : > { %v2961_v63 = vsub.f32 %v2949_v57, %v2959_v62  ;;  %v3239_v57 = vld [vmem:[%s4290_s3 + $0x50] sm:$0xff]  ;;  %v3234_v62 = vld [vmem:[%s4290_s3 + $0x28] sm:$0xff] }
 0xc8a   : > { %3855 = vmatprep.subr.mxu1 %v3239_v57 }
 0xc8b   : > { %v2963_v0 = vmul.f32 %v2961_v63, %v2961_v63  ;;  %3856 = vmatpush3.msra.mxu1 %v3239_v57 }
 0xc8c   : > { %3857 = vmatprep.subr.mxu1 %v3238_v59 }
 0xc8d   : > { %v2965_v1 = vsel %vm735_vm1, %v2963_v0, 0.0  ;;  %3858 = vmatpush3.msra.mxu1 %v3238_v59 }
 0xc8e   : > { %v2958_v2 = vpop.xlane.xlu1 %2957  ;;  %2966 = vadd.xlane.f32.xlu0 %v2965_v1 }
 0xc8f   : > { %v2960_v3 = vmul.f32 0.03125, %v2958_v2 }
 0xc91   : > { %v2962_v4 = vsub.f32 %v2950_v30, %v2960_v3  ;;  %v3237_v30 = vld [vmem:[%s4290_s3 + $0x40] sm:$0xff] }
 0xc92   : > { %3859 = vmatprep.subr.mxu1 %v3237_v30 }
 0xc93   : > { %v2964_v5 = vmul.f32 %v2962_v4, %v2962_v4  ;;  %3860 = vmatpush3.msra.mxu1 %v3237_v30 }
 0xc94   : > { %3861 = vmatprep.subr.mxu1 %v3236_v60 }
 0xc95   : > { %v2968_v20 = vsel %vm735_vm1, %v2964_v5, 0.0  ;;  %3862 = vmatpush3.msra.mxu1 %v3236_v60 }
 0xc96   : > { %2969 = vadd.xlane.f32.xlu0 %v2968_v20  ;;  %3863 = vmatprep.subr.mxu1 %v3235_v61 }
 0xc97   : > { %3864 = vmatpush3.msra.mxu1 %v3235_v61 }
 0xc98   : > { %3865 = vmatprep.subr.mxu1 %v3234_v62 }
 0xc99   : > { %3866 = vmatpush3.msra.mxu1 %v3234_v62 }
 0xd17   : > { %v2967_v10 = vpop.xlane.xlu0 %2966 }
 0xd18   : > { %v2971_v11 = vmul.f32 0.03125, %v2967_v10 }
 0xd1a   : > { %v2973_v12 = vadd.f32 1e-05, %v2971_v11  ;;  %v3611_v11 = vld [vmem:[%s703_s21] ss:$0 sm:$0xff] }
 0xd1c   : > { %4008 = vrsqrt.f32 %v2973_v12 }
 0xd1f   : > { %v2970_v13 = vpop.xlane.xlu0 %2969 }
 0xd20   : > { %v2972_v14 = vmul.f32 0.03125, %v2970_v13 }
 0xd22   : > { %v2974_v15 = vadd.f32 1e-05, %v2972_v14 }
 0xd24   : > { %4010 = vrsqrt.f32 %v2974_v15  ;;  %v3232_v15 = vld [vmem:[%s4290_s3 + $0x18] sm:$0xff] }
 0xd29   : > { %v4009_v16 = vpop.eup %4008 }
 0xd2a   : > { %v2977_v18 = vmul.f32 %v4009_v16, %v2961_v63  ;;  %v3233_v63 = vld [vmem:[%s4290_s3 + $0x20] sm:$0xff]  ;;  %v3231_v16 = vld [vmem:[%s4290_s3 + $0x10] sm:$0xff] }
 0xd2b   : > { %3867 = vmatprep.subr.mxu1 %v3233_v63 }
 0xd2c   : > { %v2985_v21 = vmul.f32 %v3605_v17, %v2977_v18  ;;  %3868 = vmatpush3.msra.mxu1 %v3233_v63  ;;  %v3229_v18 = vld [vmem:[%s4290_s3] sm:$0xff] }
 0xd2d   : > { %3869 = vmatprep.subr.mxu1 %v3232_v15 }
 0xd2e   : > { %v2993_v22 = vadd.f32 %v3606_v19, %v2985_v21  ;;  %3870 = vmatpush3.msra.mxu1 %v3232_v15 }
 0xd2f   : > { %3871 = vmatprep.subr.mxu1 %v3231_v16 }
 0xd30   : > { %3831 = vmatprep.mubr.msk.f32.mxu0 %vm735_vm1, %v2993_v22  ;;  %3872 = vmatpush3.msra.mxu1 %v3231_v16 }
 0xd31   : > { %v4011_v23 = vpop.eup %4010 }
 0xd32   : > { %v2978_v24 = vmul.f32 %v4011_v23, %v2962_v4 }
 0xd34   : > { %v2986_v25 = vmul.f32 %v3605_v17, %v2978_v24  ;;  %v3230_v17 = vld [vmem:[%s4290_s3 + $0x8] sm:$0xff] }
 0xd35   : > { %3873 = vmatprep.subr.mxu1 %v3230_v17 }
 0xd36   : > { %v2994_v26 = vadd.f32 %v3606_v19, %v2986_v25  ;;  %3874 = vmatpush3.msra.mxu1 %v3230_v17  ;;  %v3612_v19 = vld [vmem:[%s711_s20] ss:$0 sm:$0xff] }
 0xd37   : > { %3875 = vmatprep.subr.mxu1 %v3229_v18 }
 0xd38   : > { %3832 = vmatmul.mubr.msk.f32.vlgmr.msra.gmra.mxu0 %vm735_vm1, %v2994_v26  ;;  %3876 = vmatpush3.msra.mxu1 %v3229_v18 }
 0xd39   : > { %3835 = vmatpush3.msra.mxu0 %v3138_v46 }
 0xd3a   : > { %3836 = vmatprep.subr.mxu0 %v3137_v47 }
 0xd3b   : > { %3837 = vmatpush3.msra.mxu0 %v3137_v47 }
 0xd3c   : > { %3838 = vmatprep.subr.mxu0 %v3136_v48 }
 0xd3d   : > { %3839 = vmatpush3.msra.mxu0 %v3136_v48 }
 0xd3e   : > { %3840 = vmatprep.subr.mxu0 %v3135_v49 }
 0xd3f   : > { %3841 = vmatpush3.msra.mxu0 %v3135_v49 }
 0xdf8   : > { %v3833_v27 = vpop.f32.mrf.mxu0 }
 0xdf9   : > { %v3081_v31 = vadd.f32 %v4016_v29, %v3833_v27 }
 0xdfa   : > { %v3071_v41 = vpop.f32.mrf.mxu0 }
 0xdfb   : > { %v4589_v32 = vadd.f32 %v3609_v28, %v3081_v31  ;;  %v3080_v50 = vadd.f32 %v4017_v42, %v3071_v41 }
 0xdfd   : > { %v4591_v33 = vadd.f32 %v3609_v28, %v3080_v50  ;;  %v3096_v34 = vsel %vm735_vm1, %v4589_v32, 0.0  ;;  %v3615_v28 = vld [vmem:[%s719_s4] ss:$0 sm:$0xff] }
 0xdfe   : > { %3097 = vadd.xlane.f32.xlu1 %v3096_v34 }
 0xdff   : > { %v3093_v53 = vsel %vm735_vm1, %v4591_v33, 0.0 }
 0xe00   : > { %3094 = vadd.xlane.f32.xlu0 %v3093_v53 }
 0xe87   : > { %v3098_v58 = vpop.xlane.xlu1 %3097 }
 0xe88   : > { %v3100_v43 = vmul.f32 0.03125, %v3098_v58 }
 0xe89   : > { %v3095_v35 = vpop.xlane.xlu0 %3094 }
 0xe8a   : > { %v4598_v36 = vsub.f32 %v4589_v32, %v3100_v43  ;;  %v3099_v37 = vmul.f32 0.03125, %v3095_v35 }
 0xe8c   : > { %v4601_v38 = vsub.f32 %v4591_v33, %v3099_v37  ;;  %v3104_v39 = vmul.f32 %v4598_v36, %v4598_v36 }
 0xe8e   : > { %v3108_v40 = vsel %vm735_vm1, %v3104_v39, 0.0  ;;  %v3103_v44 = vmul.f32 %v4601_v38, %v4601_v38 }
 0xe8f   : > { %3109 = vadd.xlane.f32.xlu1 %v3108_v40 }
 0xe90   : > { %v3105_v45 = vsel %vm735_vm1, %v3103_v44, 0.0 }
 0xe91   : > { %3106 = vadd.xlane.f32.xlu0 %v3105_v45 }
 0xf18   : > { %v3110_v0 = vpop.xlane.xlu1 %3109 }
 0xf19   : > { %v3112_v1 = vmul.f32 0.03125, %v3110_v0 }
 0xf1a   : > { %v3107_v2 = vpop.xlane.xlu0 %3106 }
 0xf1b   : > { %v3114_v3 = vadd.f32 1e-05, %v3112_v1  ;;  %v3111_v4 = vmul.f32 0.03125, %v3107_v2 }
 0xf1d   : > { %4012 = vrsqrt.f32 %v3114_v3  ;;  %v3113_v5 = vadd.f32 1e-05, %v3111_v4 }
 0xf1f   : > { %4014 = vrsqrt.f32 %v3113_v5 }
 0xf2a   : > { %v4013_v20 = vpop.eup %4012 }
 0xf2b   : > { %v3118_v7 = vmul.f32 %v4013_v20, %v4598_v36 }
 0xf2c   : > { %v4015_v8 = vpop.eup %4014 }
 0xf2d   : > { %v3117_v9 = vmul.f32 %v4015_v8, %v4601_v38  ;;  %v3126_v10 = vmul.f32 %v3610_v6, %v3118_v7 }
 0xf2f   : > { %v3125_v12 = vmul.f32 %v3610_v6, %v3117_v9  ;;  %v3134_v14 = vadd.f32 %v3611_v11, %v3126_v10 }
 0xf31   : > { %v3133_v13 = vadd.f32 %v3611_v11, %v3125_v12 }
 0xf33   : > { %3842 = vmatprep.mubr.msk.f32.mxu0 %vm735_vm1, %v3133_v13 }
 0xf34   : > { %3843 = vmatmul.mubr.msk.f32.vlgmr.msra.gmra.mxu0 %vm735_vm1, %v3134_v14 }
 0xff4   : > { %v3844_v21 = vpop.f32.mrf.mxu0 }
 0xff5   : > { %v3224_v22 = vadd.f32 %v3844_v21, %v3612_v19 }
 0xff6   : > { %v3218_v23 = vpop.f32.mrf.mxu0 }
 0xff7   : > { %v3219_v24 = vadd.f32 %v3612_v19, %v3218_v23  ;;  %v3228_v26 = vmax.f32 %v3224_v22, 0.0 }
 0xff9   : > { %v3227_v25 = vmax.f32 %v3219_v24, 0.0 }
 0xffb   : > { %3877 = vmatprep.mubr.f32.mxu1 %v3227_v25 }
 0xffc   : > { %3878 = vmatmul.mubr.f32.vlgmr.msra.gmra.mxu1 %v3228_v26 }
0x10bc   : > { %v3879_v27 = vpop.f32.mrf.mxu1 }
0x10bd   : > { %v3321_v29 = vadd.f32 %v3879_v27, %v4589_v32 }
0x10be   : > { %v3311_v31 = vpop.f32.mrf.mxu1 }
0x10bf   : > { %v3330_v41 = vadd.f32 %v3615_v28, %v3321_v29  ;;  %v3320_v42 = vadd.f32 %v3311_v31, %v4591_v33  ;;  %3336 = sbr.rel (%p3616_p3) target bundleno = 4293 (0x10c5), region = 92 }
0x10c1   : > { %3332 = vst.msk [vmem:[#allocation2 + $0x8] sm:$0xff] %vm735_vm1, %v3330_v41  ;;  %v3329_v50 = vadd.f32 %v3615_v28, %v3320_v42 }
0x10c3   : > { %3331 = vst.msk [vmem:[#allocation2] sm:$0xff] %vm735_vm1, %v3329_v50 }
0x10c4   : > { %3337 = vst.msk [vmem:[#allocation7] sm:$0xff] %vm735_vm1, %v3329_v50  ;;  %3338 = vst.msk [vmem:[#allocation7 + $0x8] sm:$0xff] %vm735_vm1, %v3330_v41 }
0x10c5 PF: > { %s4731_s3 = sld [smem:[#allocation11_spill]]  ;;  %s4107_s4 = smov [#allocation7]  }
0x10c6   : > { %s3348_s2 = sshll.u32 %s4107_s4, 4  ;;  %s3349_s2 = int_to_ptr.vmem [resolvable:$true] %s3348_s2 }
0x10c7   : > { %s4033_s26 = scalar_lea.vmem %s3349_s2, 256  ;;  %p4040_p8 = scmp.lt.s32.totalorder %s3349_s2, %s3349_s2 }
0x10c8   : > { %p4034_p5 = scmp.ne.s32.totalorder %s3349_s2, %s4033_s26  ;;  %p4041_p9 = scmp.lt.s32.totalorder %s4033_s26, %s4033_s26 }
0x10ca   : > { %p4042_p10 = por %p4041_p9, %p4040_p8 }
0x10cb   : > { %s4732_s30 = sadd.s32 4294967295, %s4731_s3  }
0x10cc   : > { %p4662_p4 = scmp.eq.s32.totalorder %s4732_s30, 1 }
0x10ce   : > { %p4035_p6 = pnand %p4034_p5, %p4662_p4 }
0x10d0   : > { %p4036_p7 = pneg %p4035_p6 }
0x10d2   : > { %p4043_p11 = pnand %p4042_p10, %p4036_p7 }
0x10d4   : > { %4046 = shalt.err (!%p4043_p11)
}
0x10d5   : > { %s4108_s18 = smov 128   ;;  %s4734_s29 = sld [smem:[#allocation19_spill]] }
0x10db   : > { %3885 = dma.vmem_to_hbm [thread:$0]  (%p4662_p4), %s3349_s2, 256, %s4734_s29, [#allocation5], %s4108_s18, %s4108_s18, %s4105_s28  }
0x10dc   : > { %4074 = dma.done.wait (%p4662_p4), [#allocation5], 256  }
0x10dd   : > { %4076 = vsyncadd (%p4662_p4), [#allocation5], 4294967040 }
0x10de PF: > { %s4735_s27 = sld [smem:[#allocation11_spill]] }
0x10df   : > { %s4736_s18 = sld [smem:[#allocation10_spill]] }
0x10e0   : > { %s4737_s19 = sld [smem:[#allocation12_spill]] }
0x10e4   : > { %s27_s20 = sadd.s32 1, %s4735_s27  }
0x10e5   : > { %p24_p12 = scmp.ge.s32.totalorder %s27_s20, 4  }
0x10e7   :  { %26 = sbr.rel (!%p24_p12) target bundleno = 10 (0xa), region = 160 }
0x10ec   :  { %3364 = vsyncpa [#allocation5], 1 }
0x10ed   :  { %3366 = vsyncpa [#allocation5 + $0x1], 1 }
0x10ee   :  { %3367 = vsyncpa [#allocation6], 1 }
0x10ef   :  { %3369 = vsyncpa [#allocation6 + $0x1], 1 }

</bundles_post_ra>
